<compile_context>
chip_gen: v6e
topology: v6e:2x2x1
jax: 0.10.0
libtpu: 0.0.40
codegen_flags: <defaults>
</compile_context>

<pallas_src>
import functools

import jax
import jax.numpy as jnp
from jax.experimental import pallas as pl
from jax.experimental.pallas import tpu as pltpu

NUM_SENTENCE_DOC = 50
BN_EPS = 1e-5
H_IN, W_IN = 56, 4


# ------------------------------ fused kernel --------------------------------

def _generator_kernel(x_ref, noise_ref, gb_ref, m1_ref, b1_ref, m2_ref, b2_ref,
                      w3t_ref, b3_ref, w4t_ref, b4_ref, out_ref,
                      xpad_ref, p1pad_ref, feat_ref, *, n_batch, size_noise):
    # ---------------- BatchNorm2d(1): training-mode stats, single pass ------
    x = x_ref[...]                                        # (N*56, 4)
    count = float(n_batch * H_IN * W_IN)
    s1 = jnp.sum(x)
    s2 = jnp.sum(x * x)
    mean = s1 / count
    var = s2 / count - mean * mean                        # biased variance
    inv = jax.lax.rsqrt(var + BN_EPS)
    scale = gb_ref[0] * inv
    shift = gb_ref[1] - mean * scale
    xn = x * scale + shift                                # (N*56, 4)

    # Zero the padded scratch buffers (borders must be zero; interiors are
    # fully overwritten below).
    xpad_ref[...] = jnp.zeros(xpad_ref.shape, xpad_ref.dtype)
    p1pad_ref[...] = jnp.zeros(p1pad_ref.shape, p1pad_ref.dtype)

    # Per batch, a zero-padded (58, 6) block; interior rows 1..56, cols 1..4.
    for n in range(n_batch):
        xpad_ref[n * 58 + 1:n * 58 + 57, 1:5] = xn[n * 56:(n + 1) * 56, :]

    # ---------------- Conv2d(1,8,(3,2),s=1,p=(1,1)) + ReLU + MaxPool(2,1)/2 --
    # Only conv columns {0,2,4} survive the (2,1)/(2,2) pool.  Patch rows are
    # ordered (pool_slot s, batch n, pooled row p); lane = kh*6 + padded_col.
    # m1 (18, 24) maps that to output lane = pooled_col*8 + out_channel.
    blocks = []
    for s in range(2):                                    # pool-window slot (H)
        for n in range(n_batch):
            blocks.append(jnp.concatenate(
                [xpad_ref[pl.ds(n * 58 + s + kh, 28, stride=2), :]
                 for kh in range(3)], axis=1))            # (28, 18)
    patches1 = jnp.concatenate(blocks, axis=0)            # (2*N*28, 18)
    c1 = jnp.dot(patches1, m1_ref[...],
                 preferred_element_type=jnp.float32)      # (2*N*28, 24)
    half = n_batch * 28
    # max over the pool window first, then ONE bias-add + ReLU (monotonic).
    p1 = jnp.maximum(jnp.maximum(c1[0:half, :], c1[half:2 * half, :])
                     + b1_ref[...], 0.0)                  # (N*28, 24)

    # Stage pool1 output zero-padded for conv2: per batch (30, 40) with
    # lanes = padded_w*8 + c; interior rows 1..28, lanes 8..31.
    for n in range(n_batch):
        p1pad_ref[n * 30 + 1:n * 30 + 29, 8:32] = p1[n * 28:(n + 1) * 28, :]

    # ---------------- Conv2d(8,16,(3,2),s=2,p=(1,1)) + ReLU + MaxPool(2)/2 --
    # Patch rows ordered (pool_slot s2, batch n, pooled row p); lane
    # = kh*40 + padded_w*8 + c_in.  m2 (120, 32) maps that to output lane
    # = ow2*16 + out_channel (ow2 = conv2 output column, pooled below).
    blocks = []
    for s in range(2):                                    # pool-window slot (H)
        for n in range(n_batch):
            blocks.append(jnp.concatenate(
                [p1pad_ref[pl.ds(n * 30 + 2 * s + kh, 7, stride=4), :]
                 for kh in range(3)], axis=1))            # (7, 120)
    patches2 = jnp.concatenate(blocks, axis=0)            # (2*N*7, 120)
    c2 = jnp.dot(patches2, m2_ref[...],
                 preferred_element_type=jnp.float32)      # (2*N*7, 32)
    half2 = n_batch * 7
    m = jnp.maximum(c2[0:half2, :], c2[half2:2 * half2, :])   # pool over H
    m = jnp.maximum(m[:, 0:16], m[:, 16:32])                  # pool over W
    p2 = jnp.maximum(m + b2_ref[...], 0.0)                # (N*7, 16)

    # ------------- flatten (torch (C,H,W) order) + noise concat in VMEM -----
    # feat[n, h*16 + c] = p2[n*7 + h, c]; w3's columns were permuted in the
    # wrapper so this h-major order matches torch's x.view(N, -1).
    for n in range(n_batch):
        for h in range(7):
            feat_ref[n:n + 1, h * 16:(h + 1) * 16] = \
                p2[n * 7 + h:n * 7 + h + 1, :]
        feat_ref[n:n + 1, 112:112 + size_noise] = noise_ref[n:n + 1, :]

    # --------------------------------- MLP: Linear/ReLU/Linear/Sigmoid ------
    feat = feat_ref[...]                                  # (N, 112+size_noise)
    hid = jnp.dot(feat, w3t_ref[...], preferred_element_type=jnp.float32)
    hid = jnp.maximum(hid + b3_ref[...], 0.0)             # (N, 60)
    z = jnp.dot(hid, w4t_ref[...], preferred_element_type=jnp.float32)
    z = z + b4_ref[...]                                   # (N, 50)
    ez = jnp.exp(-jnp.abs(z))                             # stable sigmoid
    out_ref[...] = jnp.where(z >= 0.0, 1.0 / (1.0 + ez), ez / (1.0 + ez))


# -------------------------------- wrappers -----------------------------------

def _pack_weights(params):
    """Repack conv/linear weights (tiny, wrapper-side) into kernel layouts."""
    f32 = jnp.float32
    w1 = params["w1"].astype(f32)        # (8, 1, 3, 2)
    w2 = params["w2"].astype(f32)        # (16, 8, 3, 2)
    w3 = params["w3"].astype(f32)        # (60, 112 + size_noise)
    w4 = params["w4"].astype(f32)        # (50, 60)

    # conv1: m1[kh*6 + (2*wi + kw), wi*8 + c] = w1[c, 0, kh, kw]
    eye3 = jnp.eye(3, dtype=f32)
    m1 = jnp.concatenate(
        [jnp.kron(eye3, w1[:, 0, kh, :].T) for kh in range(3)], axis=0)   # (18,24)
    b1 = jnp.tile(params["b1"].astype(f32), 3).reshape(1, 24)

    # conv2: m2[kh*40 + w*8 + ci, ow2*16 + co] = w2[co, ci, kh, w - 2*ow2]
    eye2 = jnp.eye(2, dtype=f32)
    blocks = []
    for kh in range(3):
        bk = jnp.transpose(w2[:, :, kh, :], (2, 1, 0)).reshape(16, 16)    # (kw*8+ci, co)
        blocks.append(jnp.concatenate(
            [jnp.kron(eye2, bk), jnp.zeros((8, 32), f32)], axis=0))       # (40, 32)
    m2 = jnp.concatenate(blocks, axis=0)                                  # (120, 32)
    b2 = params["b2"].astype(f32).reshape(1, 16)

    # linear1: permute the first 112 columns from torch's (c*7 + h) flatten
    # order to the kernel's (h*16 + c) order, then transpose for feat @ w3t.
    w3_conv = jnp.transpose(w3[:, :112].reshape(60, 16, 7),
                            (0, 2, 1)).reshape(60, 112)
    w3t = jnp.concatenate([w3_conv, w3[:, 112:]], axis=1).T               # (F, 60)
    b3 = params["b3"].astype(f32).reshape(1, 60)

    w4t = w4.T                                                            # (60, 50)
    b4 = params["b4"].astype(f32).reshape(1, NUM_SENTENCE_DOC)
    return m1, b1, m2, b2, w3t, b3, w4t, b4


def generator_forward(params, x, noise):
    n = x.shape[0]
    size_noise = noise.shape[-1]
    assert x.shape[1:] == (1, H_IN, W_IN)

    x2d = x.astype(jnp.float32).reshape(n * H_IN, W_IN)   # free row-major reshape
    noise = noise.astype(jnp.float32)
    gb = jnp.stack([params["bn_gamma"], params["bn_beta"]]).astype(jnp.float32)
    m1, b1, m2, b2, w3t, b3, w4t, b4 = _pack_weights(params)

    vmem = pl.BlockSpec(memory_space=pltpu.MemorySpace.VMEM)
    smem = pl.BlockSpec(memory_space=pltpu.MemorySpace.SMEM)
    kernel = functools.partial(_generator_kernel, n_batch=n,
                               size_noise=size_noise)

    # Single block, no grid: at N=2 a grid only adds per-step overhead.  For
    # large batches, add a "parallel" grid axis over N (v7x has 2 TensorCores)
    # and tile rows in multiples of 8 to respect v7x's smaller VMEM.
    return pl.pallas_call(
        kernel,
        out_shape=jax.ShapeDtypeStruct((n, NUM_SENTENCE_DOC), jnp.float32),
        in_specs=[vmem, vmem, smem, vmem, vmem, vmem, vmem, vmem, vmem,
                  vmem, vmem],
        out_specs=vmem,
        scratch_shapes=[
            pltpu.VMEM((n * 58, 6), jnp.float32),            # padded BN output
            pltpu.VMEM((n * 30, 40), jnp.float32),           # padded pool1 out
            pltpu.VMEM((n, 112 + size_noise), jnp.float32),  # feature buffer
        ],
    )(x2d, noise, gb, m1, b1, m2, b2, w3t, b3, w4t, b4)


def init_params(key, size_noise):
    ks = jax.random.split(key, 10)

    def nrm(k, shape, scale=0.1):
        return (scale * jax.random.normal(k, shape)).astype(jnp.float32)

    return dict(
        bn_gamma=jnp.float32(1.0) + nrm(ks[0], ()),
        bn_beta=nrm(ks[1], ()),
        w1=nrm(ks[2], (8, 1, 3, 2)), b1=nrm(ks[3], (8,)),
        w2=nrm(ks[4], (16, 8, 3, 2)), b2=nrm(ks[5], (16,)),
        w3=nrm(ks[6], (60, 112 + size_noise)), b3=nrm(ks[7], (60,)),
        w4=nrm(ks[8], (NUM_SENTENCE_DOC, 60)), b4=nrm(ks[9], (NUM_SENTENCE_DOC,)),
    )


if __name__ == "__main__":
    key = jax.random.PRNGKey(0)
    k_param, k_x, k_noise = jax.random.split(key, 3)
    size_noise = 16

    x = jax.random.normal(k_x, (2, 1, H_IN, W_IN), dtype=jnp.float32)
    noise = jax.random.normal(k_noise, (2, size_noise), dtype=jnp.float32)
    params = init_params(k_param, size_noise)

    out = jax.jit(generator_forward)(params, x, noise)
    out = jax.block_until_ready(out)
    assert out.shape == (2, NUM_SENTENCE_DOC)
    assert bool(jnp.all(jnp.isfinite(out)))
    assert bool(jnp.all((out >= 0.0) & (out <= 1.0)))
    print("KERNEL_OK")
</pallas_src>

<mosaic_0001>
module attributes {stable_mosaic.version = 11 : i64} {
  func.func @_generator_kernel(%arg0: memref<112x4xf32, #tpu.memory_space<vmem>>, %arg1: memref<2x16xf32, #tpu.memory_space<vmem>>, %arg2: memref<2xf32, #tpu.memory_space<smem>>, %arg3: memref<18x24xf32, #tpu.memory_space<vmem>>, %arg4: memref<1x24xf32, #tpu.memory_space<vmem>>, %arg5: memref<120x32xf32, #tpu.memory_space<vmem>>, %arg6: memref<1x16xf32, #tpu.memory_space<vmem>>, %arg7: memref<128x60xf32, #tpu.memory_space<vmem>>, %arg8: memref<1x60xf32, #tpu.memory_space<vmem>>, %arg9: memref<60x50xf32, #tpu.memory_space<vmem>>, %arg10: memref<1x50xf32, #tpu.memory_space<vmem>>, %arg11: memref<2x50xf32, #tpu.memory_space<vmem>>, %arg12: memref<116x6xf32, #tpu.memory_space<vmem>>, %arg13: memref<60x40xf32, #tpu.memory_space<vmem>>, %arg14: memref<2x128xf32, #tpu.memory_space<vmem>>) attributes {dimension_semantics = [], scalar_prefetch = 0 : i64, scratch_operands = 3 : i64, tpu.core_type = #tpu.core_type<tc>} {
    %c0 = arith.constant 0 : index
    %c0_0 = arith.constant 0 : index
    %0 = vector.load %arg0[%c0, %c0_0] : memref<112x4xf32, #tpu.memory_space<vmem>>, vector<112x4xf32>
    %1 = vector.shape_cast %0 : vector<112x4xf32> to vector<1x112x4xf32>
    %cst = arith.constant dense<0.000000e+00> : vector<1xf32>
    %2 = vector.multi_reduction <add>, %1, %cst [1, 2] : vector<1x112x4xf32> to vector<1xf32>
    %3 = vector.shape_cast %2 : vector<1xf32> to vector<1x1x1xf32>
    %4 = vector.extract %3[0, 0, 0] : f32 from vector<1x1x1xf32>
    %5 = arith.mulf %0, %0 : vector<112x4xf32>
    %6 = vector.shape_cast %5 : vector<112x4xf32> to vector<1x112x4xf32>
    %cst_1 = arith.constant dense<0.000000e+00> : vector<1xf32>
    %7 = vector.multi_reduction <add>, %6, %cst_1 [1, 2] : vector<1x112x4xf32> to vector<1xf32>
    %8 = vector.shape_cast %7 : vector<1xf32> to vector<1x1x1xf32>
    %9 = vector.extract %8[0, 0, 0] : f32 from vector<1x1x1xf32>
    %cst_2 = arith.constant 4.480000e+02 : f32
    %10 = arith.divf %4, %cst_2 : f32
    %cst_3 = arith.constant 4.480000e+02 : f32
    %11 = arith.divf %9, %cst_3 : f32
    %12 = arith.mulf %10, %10 : f32
    %13 = arith.subf %11, %12 : f32
    %cst_4 = arith.constant 9.99999974E-6 : f32
    %14 = arith.addf %13, %cst_4 : f32
    %15 = math.rsqrt %14 : f32
    %c0_5 = arith.constant 0 : index
    %16 = memref.load %arg2[%c0_5] : memref<2xf32, #tpu.memory_space<smem>>
    %17 = arith.mulf %16, %15 : f32
    %c1 = arith.constant 1 : index
    %18 = memref.load %arg2[%c1] : memref<2xf32, #tpu.memory_space<smem>>
    %19 = arith.mulf %10, %17 : f32
    %20 = arith.subf %18, %19 : f32
    %21 = vector.broadcast %17 : f32 to vector<112x4xf32>
    %22 = arith.mulf %0, %21 : vector<112x4xf32>
    %23 = vector.broadcast %20 : f32 to vector<112x4xf32>
    %24 = arith.addf %22, %23 : vector<112x4xf32>
    %cst_6 = arith.constant 0.000000e+00 : f32
    %25 = vector.broadcast %cst_6 : f32 to vector<116x6xf32>
    %c0_7 = arith.constant 0 : index
    %c0_8 = arith.constant 0 : index
    %26 = vector.load %arg12[%c0_7, %c0_8] : memref<116x6xf32, #tpu.memory_space<vmem>>, vector<116x6xf32>
    tpu.vector_store %arg12[%c0_7, %c0_8], %25 {strides = array<i32>} : memref<116x6xf32, #tpu.memory_space<vmem>>, vector<116x6xf32>,
    %cst_9 = arith.constant 0.000000e+00 : f32
    %27 = vector.broadcast %cst_9 : f32 to vector<60x40xf32>
    %c0_10 = arith.constant 0 : index
    %c0_11 = arith.constant 0 : index
    %28 = vector.load %arg13[%c0_10, %c0_11] : memref<60x40xf32, #tpu.memory_space<vmem>>, vector<60x40xf32>
    tpu.vector_store %arg13[%c0_10, %c0_11], %27 {strides = array<i32>} : memref<60x40xf32, #tpu.memory_space<vmem>>, vector<60x40xf32>,
    %29 = vector.extract_strided_slice %24 {offsets = [0, 0], sizes = [56, 4], strides = [1, 1]} : vector<112x4xf32> to vector<56x4xf32>
    %c1_12 = arith.constant 1 : index
    %c1_13 = arith.constant 1 : index
    %30 = vector.load %arg12[%c1_12, %c1_13] : memref<116x6xf32, #tpu.memory_space<vmem>>, vector<56x4xf32>
    tpu.vector_store %arg12[%c1_12, %c1_13], %29 {strides = array<i32>} : memref<116x6xf32, #tpu.memory_space<vmem>>, vector<56x4xf32>,
    %31 = vector.extract_strided_slice %24 {offsets = [56, 0], sizes = [56, 4], strides = [1, 1]} : vector<112x4xf32> to vector<56x4xf32>
    %c59 = arith.constant 59 : index
    %c1_14 = arith.constant 1 : index
    %32 = vector.load %arg12[%c59, %c1_14] : memref<116x6xf32, #tpu.memory_space<vmem>>, vector<56x4xf32>
    tpu.vector_store %arg12[%c59, %c1_14], %31 {strides = array<i32>} : memref<116x6xf32, #tpu.memory_space<vmem>>, vector<56x4xf32>,
    %c0_15 = arith.constant 0 : index
    %c0_16 = arith.constant 0 : index
    %33 = tpu.strided_load %arg12[%c0_15, %c0_16] {strides = array<i32: 2, 1>} : memref<116x6xf32, #tpu.memory_space<vmem>>, vector<28x6xf32>
    %c1_17 = arith.constant 1 : index
    %c0_18 = arith.constant 0 : index
    %34 = tpu.strided_load %arg12[%c1_17, %c0_18] {strides = array<i32: 2, 1>} : memref<116x6xf32, #tpu.memory_space<vmem>>, vector<28x6xf32>
    %c2 = arith.constant 2 : index
    %c0_19 = arith.constant 0 : index
    %35 = tpu.strided_load %arg12[%c2, %c0_19] {strides = array<i32: 2, 1>} : memref<116x6xf32, #tpu.memory_space<vmem>>, vector<28x6xf32>
    %36 = tpu.concatenate %33, %34, %35 in 1 : vector<28x6xf32>, vector<28x6xf32>, vector<28x6xf32> -> vector<28x18xf32>
    %c58 = arith.constant 58 : index
    %c0_20 = arith.constant 0 : index
    %37 = tpu.strided_load %arg12[%c58, %c0_20] {strides = array<i32: 2, 1>} : memref<116x6xf32, #tpu.memory_space<vmem>>, vector<28x6xf32>
    %c59_21 = arith.constant 59 : index
    %c0_22 = arith.constant 0 : index
    %38 = tpu.strided_load %arg12[%c59_21, %c0_22] {strides = array<i32: 2, 1>} : memref<116x6xf32, #tpu.memory_space<vmem>>, vector<28x6xf32>
    %c60 = arith.constant 60 : index
    %c0_23 = arith.constant 0 : index
    %39 = tpu.strided_load %arg12[%c60, %c0_23] {strides = array<i32: 2, 1>} : memref<116x6xf32, #tpu.memory_space<vmem>>, vector<28x6xf32>
    %40 = tpu.concatenate %37, %38, %39 in 1 : vector<28x6xf32>, vector<28x6xf32>, vector<28x6xf32> -> vector<28x18xf32>
    %c1_24 = arith.constant 1 : index
    %c0_25 = arith.constant 0 : index
    %41 = tpu.strided_load %arg12[%c1_24, %c0_25] {strides = array<i32: 2, 1>} : memref<116x6xf32, #tpu.memory_space<vmem>>, vector<28x6xf32>
    %c2_26 = arith.constant 2 : index
    %c0_27 = arith.constant 0 : index
    %42 = tpu.strided_load %arg12[%c2_26, %c0_27] {strides = array<i32: 2, 1>} : memref<116x6xf32, #tpu.memory_space<vmem>>, vector<28x6xf32>
    %c3 = arith.constant 3 : index
    %c0_28 = arith.constant 0 : index
    %43 = tpu.strided_load %arg12[%c3, %c0_28] {strides = array<i32: 2, 1>} : memref<116x6xf32, #tpu.memory_space<vmem>>, vector<28x6xf32>
    %44 = tpu.concatenate %41, %42, %43 in 1 : vector<28x6xf32>, vector<28x6xf32>, vector<28x6xf32> -> vector<28x18xf32>
    %c59_29 = arith.constant 59 : index
    %c0_30 = arith.constant 0 : index
    %45 = tpu.strided_load %arg12[%c59_29, %c0_30] {strides = array<i32: 2, 1>} : memref<116x6xf32, #tpu.memory_space<vmem>>, vector<28x6xf32>
    %c60_31 = arith.constant 60 : index
    %c0_32 = arith.constant 0 : index
    %46 = tpu.strided_load %arg12[%c60_31, %c0_32] {strides = array<i32: 2, 1>} : memref<116x6xf32, #tpu.memory_space<vmem>>, vector<28x6xf32>
    %c61 = arith.constant 61 : index
    %c0_33 = arith.constant 0 : index
    %47 = tpu.strided_load %arg12[%c61, %c0_33] {strides = array<i32: 2, 1>} : memref<116x6xf32, #tpu.memory_space<vmem>>, vector<28x6xf32>
    %48 = tpu.concatenate %45, %46, %47 in 1 : vector<28x6xf32>, vector<28x6xf32>, vector<28x6xf32> -> vector<28x18xf32>
    %49 = tpu.concatenate %36, %40, %44, %48 in 0 : vector<28x18xf32>, vector<28x18xf32>, vector<28x18xf32>, vector<28x18xf32> -> vector<112x18xf32>
    %c0_34 = arith.constant 0 : index
    %c0_35 = arith.constant 0 : index
    %50 = vector.load %arg3[%c0_34, %c0_35] : memref<18x24xf32, #tpu.memory_space<vmem>>, vector<18x24xf32>
    %cst_36 = arith.constant dense<0.000000e+00> : vector<112x24xf32>
    %51 = tpu.matmul %49, %50, %cst_36 {dimension_numbers = #tpu.dot_dimension_numbers<[1], [0], [0], [1], [0, 0, 1, 1], [], []>} : vector<112x18xf32>, vector<18x24xf32>, vector<112x24xf32> -> vector<112x24xf32>
    %52 = vector.extract_strided_slice %51 {offsets = [0, 0], sizes = [56, 24], strides = [1, 1]} : vector<112x24xf32> to vector<56x24xf32>
    %53 = vector.extract_strided_slice %51 {offsets = [56, 0], sizes = [56, 24], strides = [1, 1]} : vector<112x24xf32> to vector<56x24xf32>
    %54 = arith.maximumf %52, %53 : vector<56x24xf32>
    %c0_37 = arith.constant 0 : index
    %c0_38 = arith.constant 0 : index
    %55 = vector.load %arg4[%c0_37, %c0_38] : memref<1x24xf32, #tpu.memory_space<vmem>>, vector<1x24xf32>
    %56 = vector.broadcast %55 : vector<1x24xf32> to vector<56x24xf32>
    %57 = arith.addf %54, %56 : vector<56x24xf32>
    %cst_39 = arith.constant 0.000000e+00 : f32
    %58 = vector.broadcast %cst_39 : f32 to vector<56x24xf32>
    %59 = arith.maximumf %57, %58 : vector<56x24xf32>
    %60 = vector.extract_strided_slice %59 {offsets = [0, 0], sizes = [28, 24], strides = [1, 1]} : vector<56x24xf32> to vector<28x24xf32>
    %c1_40 = arith.constant 1 : index
    %c8 = arith.constant 8 : index
    %61 = vector.load %arg13[%c1_40, %c8] : memref<60x40xf32, #tpu.memory_space<vmem>>, vector<28x24xf32>
    tpu.vector_store %arg13[%c1_40, %c8], %60 {strides = array<i32>} : memref<60x40xf32, #tpu.memory_space<vmem>>, vector<28x24xf32>,
    %62 = vector.extract_strided_slice %59 {offsets = [28, 0], sizes = [28, 24], strides = [1, 1]} : vector<56x24xf32> to vector<28x24xf32>
    %c31 = arith.constant 31 : index
    %c8_41 = arith.constant 8 : index
    %63 = vector.load %arg13[%c31, %c8_41] : memref<60x40xf32, #tpu.memory_space<vmem>>, vector<28x24xf32>
    tpu.vector_store %arg13[%c31, %c8_41], %62 {strides = array<i32>} : memref<60x40xf32, #tpu.memory_space<vmem>>, vector<28x24xf32>,
    %c0_42 = arith.constant 0 : index
    %c0_43 = arith.constant 0 : index
    %64 = tpu.strided_load %arg13[%c0_42, %c0_43] {strides = array<i32: 4, 1>} : memref<60x40xf32, #tpu.memory_space<vmem>>, vector<7x40xf32>
    %c1_44 = arith.constant 1 : index
    %c0_45 = arith.constant 0 : index
    %65 = tpu.strided_load %arg13[%c1_44, %c0_45] {strides = array<i32: 4, 1>} : memref<60x40xf32, #tpu.memory_space<vmem>>, vector<7x40xf32>
    %c2_46 = arith.constant 2 : index
    %c0_47 = arith.constant 0 : index
    %66 = tpu.strided_load %arg13[%c2_46, %c0_47] {strides = array<i32: 4, 1>} : memref<60x40xf32, #tpu.memory_space<vmem>>, vector<7x40xf32>
    %67 = tpu.concatenate %64, %65, %66 in 1 : vector<7x40xf32>, vector<7x40xf32>, vector<7x40xf32> -> vector<7x120xf32>
    %c30 = arith.constant 30 : index
    %c0_48 = arith.constant 0 : index
    %68 = tpu.strided_load %arg13[%c30, %c0_48] {strides = array<i32: 4, 1>} : memref<60x40xf32, #tpu.memory_space<vmem>>, vector<7x40xf32>
    %c31_49 = arith.constant 31 : index
    %c0_50 = arith.constant 0 : index
    %69 = tpu.strided_load %arg13[%c31_49, %c0_50] {strides = array<i32: 4, 1>} : memref<60x40xf32, #tpu.memory_space<vmem>>, vector<7x40xf32>
    %c32 = arith.constant 32 : index
    %c0_51 = arith.constant 0 : index
    %70 = tpu.strided_load %arg13[%c32, %c0_51] {strides = array<i32: 4, 1>} : memref<60x40xf32, #tpu.memory_space<vmem>>, vector<7x40xf32>
    %71 = tpu.concatenate %68, %69, %70 in 1 : vector<7x40xf32>, vector<7x40xf32>, vector<7x40xf32> -> vector<7x120xf32>
    %c2_52 = arith.constant 2 : index
    %c0_53 = arith.constant 0 : index
    %72 = tpu.strided_load %arg13[%c2_52, %c0_53] {strides = array<i32: 4, 1>} : memref<60x40xf32, #tpu.memory_space<vmem>>, vector<7x40xf32>
    %c3_54 = arith.constant 3 : index
    %c0_55 = arith.constant 0 : index
    %73 = tpu.strided_load %arg13[%c3_54, %c0_55] {strides = array<i32: 4, 1>} : memref<60x40xf32, #tpu.memory_space<vmem>>, vector<7x40xf32>
    %c4 = arith.constant 4 : index
    %c0_56 = arith.constant 0 : index
    %74 = tpu.strided_load %arg13[%c4, %c0_56] {strides = array<i32: 4, 1>} : memref<60x40xf32, #tpu.memory_space<vmem>>, vector<7x40xf32>
    %75 = tpu.concatenate %72, %73, %74 in 1 : vector<7x40xf32>, vector<7x40xf32>, vector<7x40xf32> -> vector<7x120xf32>
    %c32_57 = arith.constant 32 : index
    %c0_58 = arith.constant 0 : index
    %76 = tpu.strided_load %arg13[%c32_57, %c0_58] {strides = array<i32: 4, 1>} : memref<60x40xf32, #tpu.memory_space<vmem>>, vector<7x40xf32>
    %c33 = arith.constant 33 : index
    %c0_59 = arith.constant 0 : index
    %77 = tpu.strided_load %arg13[%c33, %c0_59] {strides = array<i32: 4, 1>} : memref<60x40xf32, #tpu.memory_space<vmem>>, vector<7x40xf32>
    %c34 = arith.constant 34 : index
    %c0_60 = arith.constant 0 : index
    %78 = tpu.strided_load %arg13[%c34, %c0_60] {strides = array<i32: 4, 1>} : memref<60x40xf32, #tpu.memory_space<vmem>>, vector<7x40xf32>
    %79 = tpu.concatenate %76, %77, %78 in 1 : vector<7x40xf32>, vector<7x40xf32>, vector<7x40xf32> -> vector<7x120xf32>
    %80 = tpu.concatenate %67, %71, %75, %79 in 0 : vector<7x120xf32>, vector<7x120xf32>, vector<7x120xf32>, vector<7x120xf32> -> vector<28x120xf32>
    %c0_61 = arith.constant 0 : index
    %c0_62 = arith.constant 0 : index
    %81 = vector.load %arg5[%c0_61, %c0_62] : memref<120x32xf32, #tpu.memory_space<vmem>>, vector<120x32xf32>
    %cst_63 = arith.constant dense<0.000000e+00> : vector<28x32xf32>
    %82 = tpu.matmul %80, %81, %cst_63 {dimension_numbers = #tpu.dot_dimension_numbers<[1], [0], [0], [1], [0, 0, 1, 1], [], []>} : vector<28x120xf32>, vector<120x32xf32>, vector<28x32xf32> -> vector<28x32xf32>
    %83 = vector.extract_strided_slice %82 {offsets = [0, 0], sizes = [14, 32], strides = [1, 1]} : vector<28x32xf32> to vector<14x32xf32>
    %84 = vector.extract_strided_slice %82 {offsets = [14, 0], sizes = [14, 32], strides = [1, 1]} : vector<28x32xf32> to vector<14x32xf32>
    %85 = arith.maximumf %83, %84 : vector<14x32xf32>
    %86 = vector.extract_strided_slice %85 {offsets = [0, 0], sizes = [14, 16], strides = [1, 1]} : vector<14x32xf32> to vector<14x16xf32>
    %87 = vector.extract_strided_slice %85 {offsets = [0, 16], sizes = [14, 16], strides = [1, 1]} : vector<14x32xf32> to vector<14x16xf32>
    %88 = arith.maximumf %86, %87 : vector<14x16xf32>
    %c0_64 = arith.constant 0 : index
    %c0_65 = arith.constant 0 : index
    %89 = vector.load %arg6[%c0_64, %c0_65] : memref<1x16xf32, #tpu.memory_space<vmem>>, vector<1x16xf32>
    %90 = vector.broadcast %89 : vector<1x16xf32> to vector<14x16xf32>
    %91 = arith.addf %88, %90 : vector<14x16xf32>
    %cst_66 = arith.constant 0.000000e+00 : f32
    %92 = vector.broadcast %cst_66 : f32 to vector<14x16xf32>
    %93 = arith.maximumf %91, %92 : vector<14x16xf32>
    %94 = vector.extract_strided_slice %93 {offsets = [0, 0], sizes = [1, 16], strides = [1, 1]} : vector<14x16xf32> to vector<1x16xf32>
    %c0_67 = arith.constant 0 : index
    %c0_68 = arith.constant 0 : index
    %95 = vector.load %arg14[%c0_67, %c0_68] : memref<2x128xf32, #tpu.memory_space<vmem>>, vector<1x16xf32>
    tpu.vector_store %arg14[%c0_67, %c0_68], %94 {strides = array<i32>} : memref<2x128xf32, #tpu.memory_space<vmem>>, vector<1x16xf32>,
    %96 = vector.extract_strided_slice %93 {offsets = [1, 0], sizes = [1, 16], strides = [1, 1]} : vector<14x16xf32> to vector<1x16xf32>
    %c0_69 = arith.constant 0 : index
    %c16 = arith.constant 16 : index
    %97 = vector.load %arg14[%c0_69, %c16] : memref<2x128xf32, #tpu.memory_space<vmem>>, vector<1x16xf32>
    tpu.vector_store %arg14[%c0_69, %c16], %96 {strides = array<i32>} : memref<2x128xf32, #tpu.memory_space<vmem>>, vector<1x16xf32>,
    %98 = vector.extract_strided_slice %93 {offsets = [2, 0], sizes = [1, 16], strides = [1, 1]} : vector<14x16xf32> to vector<1x16xf32>
    %c0_70 = arith.constant 0 : index
    %c32_71 = arith.constant 32 : index
    %99 = vector.load %arg14[%c0_70, %c32_71] : memref<2x128xf32, #tpu.memory_space<vmem>>, vector<1x16xf32>
    tpu.vector_store %arg14[%c0_70, %c32_71], %98 {strides = array<i32>} : memref<2x128xf32, #tpu.memory_space<vmem>>, vector<1x16xf32>,
    %100 = vector.extract_strided_slice %93 {offsets = [3, 0], sizes = [1, 16], strides = [1, 1]} : vector<14x16xf32> to vector<1x16xf32>
    %c0_72 = arith.constant 0 : index
    %c48 = arith.constant 48 : index
    %101 = vector.load %arg14[%c0_72, %c48] : memref<2x128xf32, #tpu.memory_space<vmem>>, vector<1x16xf32>
    tpu.vector_store %arg14[%c0_72, %c48], %100 {strides = array<i32>} : memref<2x128xf32, #tpu.memory_space<vmem>>, vector<1x16xf32>,
    %102 = vector.extract_strided_slice %93 {offsets = [4, 0], sizes = [1, 16], strides = [1, 1]} : vector<14x16xf32> to vector<1x16xf32>
    %c0_73 = arith.constant 0 : index
    %c64 = arith.constant 64 : index
    %103 = vector.load %arg14[%c0_73, %c64] : memref<2x128xf32, #tpu.memory_space<vmem>>, vector<1x16xf32>
    tpu.vector_store %arg14[%c0_73, %c64], %102 {strides = array<i32>} : memref<2x128xf32, #tpu.memory_space<vmem>>, vector<1x16xf32>,
    %104 = vector.extract_strided_slice %93 {offsets = [5, 0], sizes = [1, 16], strides = [1, 1]} : vector<14x16xf32> to vector<1x16xf32>
    %c0_74 = arith.constant 0 : index
    %c80 = arith.constant 80 : index
    %105 = vector.load %arg14[%c0_74, %c80] : memref<2x128xf32, #tpu.memory_space<vmem>>, vector<1x16xf32>
    tpu.vector_store %arg14[%c0_74, %c80], %104 {strides = array<i32>} : memref<2x128xf32, #tpu.memory_space<vmem>>, vector<1x16xf32>,
    %106 = vector.extract_strided_slice %93 {offsets = [6, 0], sizes = [1, 16], strides = [1, 1]} : vector<14x16xf32> to vector<1x16xf32>
    %c0_75 = arith.constant 0 : index
    %c96 = arith.constant 96 : index
    %107 = vector.load %arg14[%c0_75, %c96] : memref<2x128xf32, #tpu.memory_space<vmem>>, vector<1x16xf32>
    tpu.vector_store %arg14[%c0_75, %c96], %106 {strides = array<i32>} : memref<2x128xf32, #tpu.memory_space<vmem>>, vector<1x16xf32>,
    %c0_76 = arith.constant 0 : index
    %c0_77 = arith.constant 0 : index
    %108 = vector.load %arg1[%c0_76, %c0_77] : memref<2x16xf32, #tpu.memory_space<vmem>>, vector<1x16xf32>
    %c0_78 = arith.constant 0 : index
    %c112 = arith.constant 112 : index
    %109 = vector.load %arg14[%c0_78, %c112] : memref<2x128xf32, #tpu.memory_space<vmem>>, vector<1x16xf32>
    tpu.vector_store %arg14[%c0_78, %c112], %108 {strides = array<i32>} : memref<2x128xf32, #tpu.memory_space<vmem>>, vector<1x16xf32>,
    %110 = vector.extract_strided_slice %93 {offsets = [7, 0], sizes = [1, 16], strides = [1, 1]} : vector<14x16xf32> to vector<1x16xf32>
    %c1_79 = arith.constant 1 : index
    %c0_80 = arith.constant 0 : index
    %111 = vector.load %arg14[%c1_79, %c0_80] : memref<2x128xf32, #tpu.memory_space<vmem>>, vector<1x16xf32>
    tpu.vector_store %arg14[%c1_79, %c0_80], %110 {strides = array<i32>} : memref<2x128xf32, #tpu.memory_space<vmem>>, vector<1x16xf32>,
    %112 = vector.extract_strided_slice %93 {offsets = [8, 0], sizes = [1, 16], strides = [1, 1]} : vector<14x16xf32> to vector<1x16xf32>
    %c1_81 = arith.constant 1 : index
    %c16_82 = arith.constant 16 : index
    %113 = vector.load %arg14[%c1_81, %c16_82] : memref<2x128xf32, #tpu.memory_space<vmem>>, vector<1x16xf32>
    tpu.vector_store %arg14[%c1_81, %c16_82], %112 {strides = array<i32>} : memref<2x128xf32, #tpu.memory_space<vmem>>, vector<1x16xf32>,
    %114 = vector.extract_strided_slice %93 {offsets = [9, 0], sizes = [1, 16], strides = [1, 1]} : vector<14x16xf32> to vector<1x16xf32>
    %c1_83 = arith.constant 1 : index
    %c32_84 = arith.constant 32 : index
    %115 = vector.load %arg14[%c1_83, %c32_84] : memref<2x128xf32, #tpu.memory_space<vmem>>, vector<1x16xf32>
    tpu.vector_store %arg14[%c1_83, %c32_84], %114 {strides = array<i32>} : memref<2x128xf32, #tpu.memory_space<vmem>>, vector<1x16xf32>,
    %116 = vector.extract_strided_slice %93 {offsets = [10, 0], sizes = [1, 16], strides = [1, 1]} : vector<14x16xf32> to vector<1x16xf32>
    %c1_85 = arith.constant 1 : index
    %c48_86 = arith.constant 48 : index
    %117 = vector.load %arg14[%c1_85, %c48_86] : memref<2x128xf32, #tpu.memory_space<vmem>>, vector<1x16xf32>
    tpu.vector_store %arg14[%c1_85, %c48_86], %116 {strides = array<i32>} : memref<2x128xf32, #tpu.memory_space<vmem>>, vector<1x16xf32>,
    %118 = vector.extract_strided_slice %93 {offsets = [11, 0], sizes = [1, 16], strides = [1, 1]} : vector<14x16xf32> to vector<1x16xf32>
    %c1_87 = arith.constant 1 : index
    %c64_88 = arith.constant 64 : index
    %119 = vector.load %arg14[%c1_87, %c64_88] : memref<2x128xf32, #tpu.memory_space<vmem>>, vector<1x16xf32>
    tpu.vector_store %arg14[%c1_87, %c64_88], %118 {strides = array<i32>} : memref<2x128xf32, #tpu.memory_space<vmem>>, vector<1x16xf32>,
    %120 = vector.extract_strided_slice %93 {offsets = [12, 0], sizes = [1, 16], strides = [1, 1]} : vector<14x16xf32> to vector<1x16xf32>
    %c1_89 = arith.constant 1 : index
    %c80_90 = arith.constant 80 : index
    %121 = vector.load %arg14[%c1_89, %c80_90] : memref<2x128xf32, #tpu.memory_space<vmem>>, vector<1x16xf32>
    tpu.vector_store %arg14[%c1_89, %c80_90], %120 {strides = array<i32>} : memref<2x128xf32, #tpu.memory_space<vmem>>, vector<1x16xf32>,
    %122 = vector.extract_strided_slice %93 {offsets = [13, 0], sizes = [1, 16], strides = [1, 1]} : vector<14x16xf32> to vector<1x16xf32>
    %c1_91 = arith.constant 1 : index
    %c96_92 = arith.constant 96 : index
    %123 = vector.load %arg14[%c1_91, %c96_92] : memref<2x128xf32, #tpu.memory_space<vmem>>, vector<1x16xf32>
    tpu.vector_store %arg14[%c1_91, %c96_92], %122 {strides = array<i32>} : memref<2x128xf32, #tpu.memory_space<vmem>>, vector<1x16xf32>,
    %c1_93 = arith.constant 1 : index
    %c0_94 = arith.constant 0 : index
    %124 = vector.load %arg1[%c1_93, %c0_94] : memref<2x16xf32, #tpu.memory_space<vmem>>, vector<1x16xf32>
    %c1_95 = arith.constant 1 : index
    %c112_96 = arith.constant 112 : index
    %125 = vector.load %arg14[%c1_95, %c112_96] : memref<2x128xf32, #tpu.memory_space<vmem>>, vector<1x16xf32>
    tpu.vector_store %arg14[%c1_95, %c112_96], %124 {strides = array<i32>} : memref<2x128xf32, #tpu.memory_space<vmem>>, vector<1x16xf32>,
    %c0_97 = arith.constant 0 : index
    %c0_98 = arith.constant 0 : index
    %126 = vector.load %arg14[%c0_97, %c0_98] : memref<2x128xf32, #tpu.memory_space<vmem>>, vector<2x128xf32>
    %c0_99 = arith.constant 0 : index
    %c0_100 = arith.constant 0 : index
    %127 = vector.load %arg7[%c0_99, %c0_100] : memref<128x60xf32, #tpu.memory_space<vmem>>, vector<128x60xf32>
    %cst_101 = arith.constant dense<0.000000e+00> : vector<2x60xf32>
    %128 = tpu.matmul %126, %127, %cst_101 {dimension_numbers = #tpu.dot_dimension_numbers<[1], [0], [0], [1], [0, 0, 1, 1], [], []>} : vector<2x128xf32>, vector<128x60xf32>, vector<2x60xf32> -> vector<2x60xf32>
    %c0_102 = arith.constant 0 : index
    %c0_103 = arith.constant 0 : index
    %129 = vector.load %arg8[%c0_102, %c0_103] : memref<1x60xf32, #tpu.memory_space<vmem>>, vector<1x60xf32>
    %130 = vector.broadcast %129 : vector<1x60xf32> to vector<2x60xf32>
    %131 = arith.addf %128, %130 : vector<2x60xf32>
    %cst_104 = arith.constant 0.000000e+00 : f32
    %132 = vector.broadcast %cst_104 : f32 to vector<2x60xf32>
    %133 = arith.maximumf %131, %132 : vector<2x60xf32>
    %c0_105 = arith.constant 0 : index
    %c0_106 = arith.constant 0 : index
    %134 = vector.load %arg9[%c0_105, %c0_106] : memref<60x50xf32, #tpu.memory_space<vmem>>, vector<60x50xf32>
    %cst_107 = arith.constant dense<0.000000e+00> : vector<2x50xf32>
    %135 = tpu.matmul %133, %134, %cst_107 {dimension_numbers = #tpu.dot_dimension_numbers<[1], [0], [0], [1], [0, 0, 1, 1], [], []>} : vector<2x60xf32>, vector<60x50xf32>, vector<2x50xf32> -> vector<2x50xf32>
    %c0_108 = arith.constant 0 : index
    %c0_109 = arith.constant 0 : index
    %136 = vector.load %arg10[%c0_108, %c0_109] : memref<1x50xf32, #tpu.memory_space<vmem>>, vector<1x50xf32>
    %137 = vector.broadcast %136 : vector<1x50xf32> to vector<2x50xf32>
    %138 = arith.addf %135, %137 : vector<2x50xf32>
    %139 = math.absf %138 : vector<2x50xf32>
    %cst_110 = arith.constant 0.000000e+00 : f32
    %140 = vector.broadcast %cst_110 : f32 to vector<2x50xf32>
    %141 = arith.subf %140, %139 : vector<2x50xf32>
    %142 = math.exp %141 : vector<2x50xf32>
    %cst_111 = arith.constant 0.000000e+00 : f32
    %143 = vector.broadcast %cst_111 : f32 to vector<2x50xf32>
    %144 = arith.cmpf oge, %138, %143 : vector<2x50xf32>
    %cst_112 = arith.constant 1.000000e+00 : f32
    %145 = vector.broadcast %cst_112 : f32 to vector<2x50xf32>
    %146 = arith.addf %145, %142 : vector<2x50xf32>
    %cst_113 = arith.constant 1.000000e+00 : f32
    %147 = vector.broadcast %cst_113 : f32 to vector<2x50xf32>
    %148 = arith.divf %147, %146 : vector<2x50xf32>
    %cst_114 = arith.constant 1.000000e+00 : f32
    %149 = vector.broadcast %cst_114 : f32 to vector<2x50xf32>
    %150 = arith.addf %149, %142 : vector<2x50xf32>
    %151 = arith.divf %142, %150 : vector<2x50xf32>
    %152 = arith.select %144, %148, %151 : vector<2x50xi1>, vector<2x50xf32>
    %c0_115 = arith.constant 0 : index
    %c0_116 = arith.constant 0 : index
    %153 = vector.load %arg11[%c0_115, %c0_116] : memref<2x50xf32, #tpu.memory_space<vmem>>, vector<2x50xf32>
    tpu.vector_store %arg11[%c0_115, %c0_116], %152 {strides = array<i32>} : memref<2x50xf32, #tpu.memory_space<vmem>>, vector<2x50xf32>,
    return
  }
}

</mosaic_0001>

<bundles_post_ra>
// kernel: tile.8
= control target key start
LH: loop header
LB: loop body
LE: loop exit
PB: predicated region body
PF: predicated region fallthrough
CT: control target
= control target key end

     0   :  { %s22_s0 = inlined_call_operand.vmem [shape: f32[8], index: 0, kind: input, shape index: {}]   ;;  %s23_s1 = inlined_call_operand.vmem [shape: f32[3,8], index: 1, kind: output, shape index: {}]  }
   0x1   :  { %v4_v0 = vld [vmem:[%s22_s0] ss:$0 sm:$0xff] }
   0x2   :  { %5 = vst [vmem:[%s23_s1] sm:$0xf] %v4_v0 }

// kernel: tile.9
= control target key start
LH: loop header
LB: loop body
LE: loop exit
PB: predicated region body
PF: predicated region fallthrough
CT: control target
= control target key end

     0   :  { %vm8_vm0 = vcmask 64512   ;;  %s33_s8 = smov 8   ;;  %vm14_vm1 = vcmask 195712   ;;  %vm20_vm2 = vcmask 130112   ;;  %s50_s0 = inlined_call_operand.vmem [shape: f32[3,8], index: 0, kind: input, shape index: {}]   ;;  %s51_s1 = inlined_call_operand.vmem [shape: f32[1,24], index: 1, kind: output, shape index: {}]  }
   0x1   :  { %v5_v0 = vld [vmem:[%s50_s0] sm:$0xf]  ;;  %s32_s0 = smov 16  }
   0x2   :  { %6 = vst [vmem:[#allocation1] sm:$0xf] %v5_v0 }
   0x9   :  { %v11_v1 = vld [vmem:[#allocation1 + $0x2] sm:$0x1]   ;;  %v7_v2 = vld [vmem:[#allocation1] sm:$0x1]   ;;  %v17_v3 = vld [vmem:[#allocation1 + $0x1] sm:$0x1]  }
   0xa   :  { %12 = vrot.lane.b32.xlu0 %v11_v1, %s32_s0  ;;  %9 = vst.msk [vmem:[#allocation0] sm:$0x1] %vm8_vm0, %v7_v2  }
   0xe   :  { %18 = vrot.lane.b32.xlu0 %v17_v3, %s33_s8 }
  0x7c   :  { %v13_v4 = vpop.permute.xlu0 %12  }
  0x7d   :  { %15 = vst.msk [vmem:[#allocation0] sm:$0x1] %vm14_vm1, %v13_v4  }
  0x80   :  { %v19_v5 = vpop.permute.xlu0 %18  }
  0x81   :  { %21 = vst.msk [vmem:[#allocation0] sm:$0x1] %vm20_vm2, %v19_v5  }
  0x88   :  { %v26_v6 = vld [vmem:[#allocation0] sm:$0x1] }
  0x89   :  { %29 = vst [vmem:[%s51_s1] sm:$0x1] %v26_v6 }

// kernel: generator_forward.1
= control target key start
LH: loop header
LB: loop body
LE: loop exit
PB: predicated region body
PF: predicated region fallthrough
CT: control target
= control target key end

     0   :  { %16 = vsyncpa [#allocation7], 0  ;;  %s2201_s0 = inlined_call_operand.vmem [shape: f32[112,4], index: 0, kind: input, shape index: {}]   ;;  %s2202_s1 = inlined_call_operand.vmem [shape: f32[2,16], index: 1, kind: input, shape index: {}]   ;;  %s2203_s2 = inlined_call_operand.vmem [shape: f32[2], index: 2, kind: input, shape index: {}]   ;;  %s2204_s3 = inlined_call_operand.vmem [shape: f32[18,24], index: 3, kind: input, shape index: {}]   ;;  %s2205_s4 = inlined_call_operand.vmem [shape: f32[1,24], index: 4, kind: input, shape index: {}]   ;;  %s2206_s5 = inlined_call_operand.vmem [shape: f32[120,32], index: 5, kind: input, shape index: {}]   ;;  %s2207_s6 = inlined_call_operand.vmem [shape: f32[1,16], index: 6, kind: input, shape index: {}]   ;;  %s2208_s7 = inlined_call_operand.vmem [shape: f32[128,60], index: 7, kind: input, shape index: {}]   ;;  %s2209_s8 = inlined_call_operand.vmem [shape: f32[1,60], index: 8, kind: input, shape index: {}]   ;;  %s2210_s9 = inlined_call_operand.vmem [shape: f32[60,50], index: 9, kind: input, shape index: {}]   ;;  %s2211_s10 = inlined_call_operand.vmem [shape: f32[1,50], index: 10, kind: input, shape index: {}]   ;;  %s2212_s11 = inlined_call_operand.hbm [shape: f32[2,50], index: 11, kind: output, shape index: {}]  }
   0x1   :  { %17 = vsyncpa [#allocation6], 0  ;;  %s28_s19 = sshll.u32 %s2203_s2, 4  ;;  %s29_s19 = int_to_ptr.vmem [resolvable:$true] %s28_s19 }
   0x2   :  { %s1533_s20 = scalar_lea.vmem %s29_s19, 16  ;;  %p1538_p1 = scmp.lt.s32.totalorder %s29_s19, %s29_s19 }
   0x3   :  { %p1534_p0 = scmp.ne.s32.totalorder %s29_s19, %s1533_s20  ;;  %p1539_p2 = scmp.lt.s32.totalorder %s1533_s20, %s1533_s20 }
   0x5   :  { %p1540_p3 = por %p1539_p2, %p1538_p1 }
   0x7   :  { %p1541_p4 = pnand %p1540_p3, %p1534_p0 }
   0x9   :  { %1544 = shalt.err (!%p1541_p4)
}
   0xa   :  { %s1569_s21 = smov [#allocation5]  }
   0xb   :  { %31 = dma.vmem_to_smem %s29_s19, 16, %s1569_s21, [#allocation7]  }
   0xc   :  { %1565 = dma.done.wait [#allocation7], 16  }
   0xd   :  { %1566 = vsyncadd [#allocation7], 4294967280 }
   0xe   :  { %51 = sfence }
   0xf   :  { %v1651_v0 = vld [vmem:[%s2201_s0] sm:$0xff]  ;;  %v1656_v1 = vld [vmem:[%s2201_s0 + $0x8] sm:$0xff]  ;;  %v1661_v2 = vld [vmem:[%s2201_s0 + $0x10] sm:$0xff]  ;;  %vm66_vm0 = vcmask 31744   ;;  %vm200_vm1 = vcmask 48128   ;;  %s165_s16 = sld [smem:[#allocation5]] }
  0x10   :  { %v1666_v3 = vld [vmem:[%s2201_s0 + $0x18] sm:$0xff]  ;;  %v67_v4 = vsel %vm66_vm0, %v1651_v0, 0.0  ;;  %v68_v5 = vsel %vm66_vm0, %v1656_v1, 0.0  ;;  %v70_v6 = vsel %vm66_vm0, %v1661_v2, 0.0  ;;  %v1677_v7 = vld [vmem:[%s2201_s0 + $0x20] sm:$0xff]  ;;  %v1684_v10 = vld [vmem:[%s2201_s0 + $0x28] sm:$0xff]  ;;  %v103_v14 = vmul.f32 %v1651_v0, %v1651_v0 }
  0x11   :  { %v69_v8 = vadd.f32 %v68_v5, %v67_v4  ;;  %v72_v9 = vsel %vm66_vm0, %v1666_v3, 0.0  ;;  %v1689_v12 = vld [vmem:[%s2201_s0 + $0x30] sm:$0xff]  ;;  %v74_v13 = vsel %vm66_vm0, %v1677_v7, 0.0  ;;  %v104_v15 = vmul.f32 %v1656_v1, %v1656_v1  ;;  %v1706_v20 = vld [vmem:[%s2201_s0 + $0x38] sm:$0xff]  ;;  %v1718_v27 = vld [vmem:[%s2201_s0 + $0x40] sm:$0xff]  ;;  %s1300_s17 = sld [smem:[#allocation5 + $0x1]] }
  0x12   :  { %v105_v16 = vmul.f32 %v1661_v2, %v1661_v2  ;;  %v76_v18 = vsel %vm66_vm0, %v1684_v10, 0.0  ;;  %v106_v19 = vmul.f32 %v1666_v3, %v1666_v3  ;;  %v78_v22 = vsel %vm66_vm0, %v1689_v12, 0.0  ;;  %v1728_v33 = vld [vmem:[%s2201_s0 + $0x48] sm:$0xff]  ;;  %v1738_v39 = vld [vmem:[%s2201_s0 + $0x50] sm:$0xff]  ;;  %v1748_v45 = vld [vmem:[%s2201_s0 + $0x58] sm:$0xff]  ;;  %s1571_s22 = smov 1  }
  0x13   :  { %v71_v11 = vadd.f32 %v70_v6, %v69_v8  ;;  %v107_v23 = vmul.f32 %v1677_v7, %v1677_v7  ;;  %v117_v24 = vsel %vm66_vm0, %v103_v14, 0.0  ;;  %v118_v25 = vsel %vm66_vm0, %v104_v15, 0.0  ;;  %v1758_v51 = vld [vmem:[%s2201_s0 + $0x60] sm:$0xff]  ;;  %v1768_v57 = vld [vmem:[%s2201_s0 + $0x68] sm:$0xff]  ;;  %s1573_s28 = smov 12   ;;  %s1581_s25 = smov 64  }
  0x14   :  { %v120_v26 = vsel %vm66_vm0, %v105_v16, 0.0  ;;  %v119_v29 = vadd.f32 %v118_v25, %v117_v24  ;;  %v80_v30 = vsel %vm66_vm0, %v1706_v20, 0.0  ;;  %v108_v31 = vmul.f32 %v1684_v10, %v1684_v10 }
  0x15   :  { %v73_v17 = vadd.f32 %v72_v9, %v71_v11  ;;  %v122_v32 = vsel %vm66_vm0, %v106_v19, 0.0  ;;  %v82_v36 = vsel %vm66_vm0, %v1718_v27, 0.0  ;;  %v109_v37 = vmul.f32 %v1689_v12, %v1689_v12 }
  0x16   :  { %v121_v35 = vadd.f32 %v120_v26, %v119_v29  ;;  %v124_v38 = vsel %vm66_vm0, %v107_v23, 0.0  ;;  %v84_v42 = vsel %vm66_vm0, %v1728_v33, 0.0  ;;  %v110_v43 = vmul.f32 %v1706_v20, %v1706_v20 }
  0x17   :  { %v75_v21 = vadd.f32 %v74_v13, %v73_v17  ;;  %v126_v44 = vsel %vm66_vm0, %v108_v31, 0.0  ;;  %v86_v48 = vsel %vm66_vm0, %v1738_v39, 0.0  ;;  %v111_v49 = vmul.f32 %v1718_v27, %v1718_v27 }
  0x18   :  { %v123_v41 = vadd.f32 %v122_v32, %v121_v35  ;;  %v128_v50 = vsel %vm66_vm0, %v109_v37, 0.0  ;;  %v88_v54 = vsel %vm66_vm0, %v1748_v45, 0.0  ;;  %v112_v55 = vmul.f32 %v1728_v33, %v1728_v33 }
  0x19   :  { %v77_v28 = vadd.f32 %v76_v18, %v75_v21  ;;  %v130_v56 = vsel %vm66_vm0, %v110_v43, 0.0  ;;  %v90_v60 = vsel %vm66_vm0, %v1758_v51, 0.0  ;;  %v113_v61 = vmul.f32 %v1738_v39, %v1738_v39 }
  0x1a   :  { %v125_v47 = vadd.f32 %v124_v38, %v123_v41  ;;  %v132_v62 = vsel %vm66_vm0, %v111_v49, 0.0  ;;  %v92_v5 = vsel %vm66_vm0, %v1768_v57, 0.0  ;;  %v114_v6 = vmul.f32 %v1748_v45, %v1748_v45 }
  0x1b   :  { %v79_v34 = vadd.f32 %v78_v22, %v77_v28  ;;  %v134_v8 = vsel %vm66_vm0, %v112_v55, 0.0  ;;  %v115_v13 = vmul.f32 %v1758_v51, %v1758_v51  ;;  %v136_v14 = vsel %vm66_vm0, %v113_v61, 0.0 }
  0x1c   :  { %v127_v53 = vadd.f32 %v126_v44, %v125_v47  ;;  %v116_v17 = vmul.f32 %v1768_v57, %v1768_v57  ;;  %v138_v18 = vsel %vm66_vm0, %v114_v6, 0.0  ;;  %v1570_v43 = vmov 0.0  }
  0x1d   :  { %v81_v40 = vadd.f32 %v80_v30, %v79_v34  ;;  %v140_v21 = vsel %vm66_vm0, %v115_v13, 0.0  ;;  %203 = vst.msk [vmem:[#allocation2 + $0x10] sm:$0xff] %vm200_vm1, %v1570_v43  ;;  %204 = vst.msk [vmem:[#allocation2 + $0x18] sm:$0xff] %vm200_vm1, %v1570_v43  ;;  %vm215_vm2 = vcmask 44032   ;;  %vm255_vm3 = vcmask 39944   ;;  %v542_v13 = vld [vmem:[%s2204_s3 + $0x8] sm:$0xff] }
  0x1e   :  { %v129_v59 = vadd.f32 %v128_v50, %v127_v53  ;;  %v142_v23 = vsel %vm66_vm0, %v116_v17, 0.0  ;;  %201 = vst.msk [vmem:[#allocation2] sm:$0xff] %vm200_vm1, %v1570_v43  ;;  %202 = vst.msk [vmem:[#allocation2 + $0x8] sm:$0xff] %vm200_vm1, %v1570_v43  ;;  %vm581_vm4 = vcmask 1041408   ;;  %vm357_vm5 = vcmask 97280  }
  0x1f   :  { %v83_v46 = vadd.f32 %v82_v36, %v81_v40  ;;  %205 = vst.msk [vmem:[#allocation2 + $0x20] sm:$0xff] %vm200_vm1, %v1570_v43  ;;  %206 = vst.msk [vmem:[#allocation2 + $0x28] sm:$0xff] %vm200_vm1, %v1570_v43  ;;  %vm544_vm6 = vcmask 146432   ;;  %vm518_vm7 = vcmask 1043456   ;;  %vm217_vm8 = vcmask 326656  }
  0x20   :  { %v131_v4 = vadd.f32 %v130_v56, %v129_v59  ;;  %207 = vst.msk [vmem:[#allocation2 + $0x30] sm:$0xff] %vm200_vm1, %v1570_v43  ;;  %208 = vst.msk [vmem:[#allocation2 + $0x38] sm:$0xff] %vm200_vm1, %v1570_v43  ;;  %vm225_vm9 = vcmask 322560   ;;  %vm764_vm10 = vcmask 261184   ;;  %vm768_vm11 = vcmask 257088  }
  0x21   :  { %v85_v52 = vadd.f32 %v84_v42, %v83_v46  ;;  %209 = vst.msk [vmem:[#allocation2 + $0x40] sm:$0xff] %vm200_vm1, %v1570_v43  ;;  %210 = vst.msk [vmem:[#allocation2 + $0x48] sm:$0xff] %vm200_vm1, %v1570_v43  ;;  %vm782_vm12 = vcmask 261188   ;;  %vm801_vm13 = vcmask 654336   ;;  %vm856_vm14 = vcmask 1046528  }
  0x22   :  { %v133_v11 = vadd.f32 %v132_v62, %v131_v4  ;;  %211 = vst.msk [vmem:[#allocation2 + $0x50] sm:$0xff] %vm200_vm1, %v1570_v43  ;;  %212 = vst.msk [vmem:[#allocation2 + $0x58] sm:$0xff] %vm200_vm1, %v1570_v43  ;;  %vm858_vm15 = vcmask 1045504   ;;  %vm877_vm0 = vcmask 982016  }
  0x23   :  { %v87_v58 = vadd.f32 %v86_v48, %v85_v52  ;;  %213 = vst.msk [vmem:[#allocation2 + $0x60] sm:$0xff] %vm200_vm1, %v1570_v43  ;;  %214 = vst.msk [vmem:[#allocation2 + $0x68] sm:$0xff] %vm200_vm1, %v1570_v43 }
  0x24   :  { %v135_v16 = vadd.f32 %v134_v8, %v133_v11  ;;  %216 = vst.msk [vmem:[#allocation2 + $0x70] sm:$0xf] %vm215_vm2, %v1570_v43  ;;  %vm1047_vm2 = vcmask 130055  }
  0x25   :  { %v89_v63 = vadd.f32 %v88_v54, %v87_v58  ;;  %218 = vst.msk [vmem:[#allocation3] sm:$0xff] %vm217_vm8, %v1570_v43  ;;  %219 = vst.msk [vmem:[#allocation3 + $0x8] sm:$0xff] %vm217_vm8, %v1570_v43 }
  0x26   :  { %v137_v19 = vadd.f32 %v136_v14, %v135_v16  ;;  %v541_v14 = vld [vmem:[%s2204_s3] sm:$0xff]  ;;  %220 = vst.msk [vmem:[#allocation3 + $0x10] sm:$0xff] %vm217_vm8, %v1570_v43  ;;  %221 = vst.msk [vmem:[#allocation3 + $0x18] sm:$0xff] %vm217_vm8, %v1570_v43 }
  0x27   :  { %v91_v9 = vadd.f32 %v90_v60, %v89_v63  ;;  %222 = vst.msk [vmem:[#allocation3 + $0x20] sm:$0xff] %vm217_vm8, %v1570_v43  ;;  %223 = vst.msk [vmem:[#allocation3 + $0x28] sm:$0xff] %vm217_vm8, %v1570_v43 }
  0x28   :  { %v139_v22 = vadd.f32 %v138_v18, %v137_v19  ;;  %224 = vst.msk [vmem:[#allocation3 + $0x30] sm:$0xff] %vm217_vm8, %v1570_v43 }
  0x29   :  { %v93_v15 = vadd.f32 %v92_v5, %v91_v9  ;;  %226 = vst.msk [vmem:[#allocation3 + $0x38] sm:$0xf] %vm225_vm9, %v1570_v43  ;;  %vm1063_vm9 = vcmask 518530  }
  0x2a   :  { %v141_v24 = vadd.f32 %v140_v21, %v139_v22 }
  0x2b   :  { %94 = vadd.xlane.f32.xlu0 %v93_v15 }
  0x2c   :  { %v143_v25 = vadd.f32 %v142_v23, %v141_v24 }
  0x2f   :  { %144 = vadd.xlane.f32.xlu0 %v143_v25 }
  0xb4   :  { %v95_v26 = vpop.xlane.xlu0 %94 }
  0xb5   :  { %v96_v28 = vrot.slane %v95_v26, 4 }
  0xb7   :  { %v97_v29 = vadd.f32 %v96_v28, %v95_v26 }
  0xb8   :  { %v145_v32 = vpop.xlane.xlu0 %144 }
  0xb9   :  { %v98_v30 = vrot.slane %v97_v29, 2  ;;  %v146_v34 = vrot.slane %v145_v32, 4 }
  0xbb   :  { %v99_v31 = vadd.f32 %v98_v30, %v97_v29  ;;  %v147_v36 = vadd.f32 %v146_v34, %v145_v32 }
  0xbd   :  { %v100_v35 = vrot.slane %v99_v31, 1  ;;  %v148_v38 = vrot.slane %v147_v36, 2 }
  0xbf   :  { %v101_v37 = vadd.f32 %v100_v35, %v99_v31  ;;  %v149_v40 = vadd.f32 %v148_v38, %v147_v36 }
  0xc1   :  { %1505 = vpush %v101_v37  ;;  %v150_v41 = vrot.slane %v149_v40, 1 }
  0xc3   :  { %v151_v42 = vadd.f32 %v150_v41, %v149_v40 }
  0xc5   :  { %1507 = vpush %v151_v42 }
  0xf2   :  { %s1506_s0 = spop %1505 }
  0xf3   :  { %s155_s29 = smul.f32 0.002232143, %s1506_s0 }
  0xf5   :  { %s159_s30 = smul.f32 %s155_s29, %s155_s29 }
  0xf6   :  { %s1508_s12 = spop %1507 }
  0xf7   :  { %s158_s13 = smul.f32 0.002232143, %s1508_s12  ;;  %s1578_s12 = smov 16  }
  0xf9   :  { %s160_s14 = ssub.f32 %s158_s13, %s159_s30  ;;  %s1574_s30 = smov 8  }
  0xfb   :  { %s161_s15 = sadd.f32 1e-05, %s160_s14 }
  0xfd   :  { %v162_v44 = vstv %s161_s15 }
  0xfe   :  { %1527 = vrsqrt.f32 %v162_v44 }
 0x10b   :  { %v1528_v46 = vpop.eup %1527 }
 0x10c   :  { %1509 = vpush %v1528_v46 }
 0x13d   :  { %s1510_s18 = spop %1509 }
 0x13e   :  { %s166_s19 = smul.f32 %s1510_s18, %s165_s16  ;;  %s1575_s16 = smov 40  }
 0x140   :  { %s168_s20 = smul.f32 %s166_s19, %s155_s29  ;;  %v170_v47 = vstv %s166_s19  ;;  %s1576_s19 = smov 80  }
 0x141   :  { %v173_v48 = vmul.f32 %v170_v47, %v1661_v2  ;;  %v171_v49 = vmul.f32 %v170_v47, %v1651_v0  ;;  %v180_v54 = vmul.f32 %v170_v47, %v1728_v33  ;;  %v172_v55 = vmul.f32 %v170_v47, %v1656_v1 }
 0x142   :  { %s169_s21 = ssub.f32 %s1300_s17, %s168_s20  ;;  %v182_v0 = vmul.f32 %v170_v47, %v1748_v45  ;;  %v174_v2 = vmul.f32 %v170_v47, %v1666_v3  ;;  %v184_v33 = vmul.f32 %v170_v47, %v1768_v57  ;;  %v178_v1 = vmul.f32 %v170_v47, %v1706_v20  ;;  %s1579_s17 = smov 32  }
 0x143   :  { %v179_v45 = vmul.f32 %v170_v47, %v1718_v27  ;;  %v175_v3 = vmul.f32 %v170_v47, %v1677_v7  ;;  %v176_v57 = vmul.f32 %v170_v47, %v1684_v10  ;;  %v177_v20 = vmul.f32 %v170_v47, %v1689_v12  ;;  %v543_v12 = vld [vmem:[%s2204_s3 + $0x10] sm:$0x3]  ;;  %s1572_s3 = smov 6  }
 0x144   :  { %v185_v50 = vstv %s169_s21  ;;  %v181_v27 = vmul.f32 %v170_v47, %v1738_v39  ;;  %v183_v7 = vmul.f32 %v170_v47, %v1758_v51  ;;  %1388 = vmatprep.subr.msk.mxu0 %vm581_vm4, %v543_v12  ;;  %s1580_s21 = smov 48  }
 0x145   :  { %v188_v52 = vadd.f32 %v185_v50, %v173_v48  ;;  %v186_v53 = vadd.f32 %v185_v50, %v171_v49  ;;  %v195_v56 = vadd.f32 %v185_v50, %v180_v54  ;;  %v187_v58 = vadd.f32 %v185_v50, %v172_v55  ;;  %1389 = vmatpush3.msk.msra.mxu0 %vm581_vm4, %v543_v12 }
 0x146   :  { %v197_v59 = vadd.f32 %v185_v50, %v182_v0  ;;  %v189_v60 = vadd.f32 %v185_v50, %v174_v2  ;;  %v199_v61 = vadd.f32 %v185_v50, %v184_v33  ;;  %v193_v62 = vadd.f32 %v185_v50, %v178_v1  ;;  %1390 = vmatprep.subr.mxu0 %v542_v13 }
 0x147   :  { %238 = vrot.lane.b32.xlu0 %v188_v52, %s1571_s22  ;;  %234 = vrot.lane.b32.xlu1 %v186_v53, %s1571_s22  ;;  %v194_v63 = vadd.f32 %v185_v50, %v179_v45  ;;  %v190_v4 = vadd.f32 %v185_v50, %v175_v3  ;;  %v191_v5 = vadd.f32 %v185_v50, %v176_v57 }
 0x148   :  { %v192_v6 = vadd.f32 %v185_v50, %v177_v20  ;;  %v196_v8 = vadd.f32 %v185_v50, %v181_v27  ;;  %v198_v9 = vadd.f32 %v185_v50, %v183_v7  ;;  %1391 = vmatpush3.msra.mxu0 %v542_v13 }
 0x149   :  { %1392 = vmatprep.subr.mxu0 %v541_v14 }
 0x14a   :  { %1393 = vmatpush3.msra.mxu0 %v541_v14 }
 0x14b   :  { %274 = vrot.lane.b32.xlu0 %v195_v56, %s1571_s22  ;;  %236 = vrot.lane.b32.xlu1 %v187_v58, %s1571_s22 }
 0x14c   :  { %1451 = vmatprep.subr.mxu0 %v1570_v43 }
 0x14f   :  { %278 = vrot.lane.b32.xlu0 %v197_v59, %s1571_s22  ;;  %240 = vrot.lane.b32.xlu1 %v189_v60, %s1571_s22 }
 0x153   :  { %282 = vrot.lane.b32.xlu0 %v199_v61, %s1571_s22  ;;  %270 = vrot.lane.b32.xlu1 %v193_v62, %s1571_s22 }
 0x157   :  { %272 = vrot.lane.b32.xlu1 %v194_v63, %s1571_s22 }
 0x15b   :  { %242 = vrot.lane.b32.xlu1 %v190_v4, %s1571_s22 }
 0x15f   :  { %244 = vrot.lane.b32.xlu1 %v191_v5, %s1571_s22 }
 0x163   :  { %246 = vrot.lane.b32.xlu1 %v192_v6, %s1571_s22 }
 0x167   :  { %276 = vrot.lane.b32.xlu1 %v196_v8, %s1571_s22 }
 0x16b   :  { %280 = vrot.lane.b32.xlu1 %v198_v9, %s1571_s22 }
 0x1b9   :  { %v239_v10 = vpop.permute.xlu0 %238  ;;  %v235_v11 = vpop.permute.xlu1 %234 }
 0x1ba   :  { %258 = vst.msk [vmem:[#allocation2 + $0x11] sm:$0xff] %vm255_vm3, %v239_v10  ;;  %256 = vst.msk [vmem:[#allocation2 + $0x1] sm:$0xff] %vm255_vm3, %v235_v11 }
 0x1bd   :  { %v275_v39 = vpop.permute.xlu0 %274  ;;  %v237_v51 = vpop.permute.xlu1 %236 }
 0x1be   :  { %293 = vst.msk [vmem:[#allocation2 + $0x4b] sm:$0xff] %vm255_vm3, %v275_v39  ;;  %257 = vst.msk [vmem:[#allocation2 + $0x9] sm:$0xff] %vm255_vm3, %v237_v51 }
 0x1c1   :  { %v279_v15 = vpop.permute.xlu0 %278  ;;  %v241_v16 = vpop.permute.xlu1 %240 }
 0x1c2   :  { %295 = vst.msk [vmem:[#allocation2 + $0x5b] sm:$0xff] %vm255_vm3, %v279_v15  ;;  %259 = vst.msk [vmem:[#allocation2 + $0x19] sm:$0xff] %vm255_vm3, %v241_v16 }
 0x1c5   :  { %v283_v17 = vpop.permute.xlu0 %282  ;;  %v271_v18 = vpop.permute.xlu1 %270  ;;  %v1863_v19 = vld [vmem:[#allocation2 + $0x1] ss:$2 sm:$0xff]  ;;  %v314_v22 = vld [vmem:[#allocation2 + $0x2] ss:$2 sm:$0xff] }
 0x1c6   :  { %297 = vst.msk [vmem:[#allocation2 + $0x6b] sm:$0xff] %vm255_vm3, %v283_v17  ;;  %291 = vst.msk [vmem:[#allocation2 + $0x3b] sm:$0xff] %vm255_vm3, %v271_v18  ;;  %325 = vrot.lane.b32.xlu1 %v1863_v19, %s1572_s3  ;;  %v427_v47 = vld [vmem:[#allocation2 + $0x3] ss:$2 sm:$0xff]  ;;  %v298_v58 = vld [vmem:[#allocation2] ss:$2 sm:$0xff] }
 0x1c9   :  { %v273_v21 = vpop.permute.xlu1 %272  ;;  %v1869_v23 = vld [vmem:[#allocation2 + $0x11] ss:$2 sm:$0xff]  ;;  %v316_v25 = vld [vmem:[#allocation2 + $0x12] ss:$2 sm:$0xff] }
 0x1ca   :  { %292 = vst.msk [vmem:[#allocation2 + $0x43] sm:$0xff] %vm255_vm3, %v273_v21  ;;  %341 = vrot.lane.b32.xlu1 %v314_v22, %s1573_s28  ;;  %327 = vrot.lane.b32.xlu0 %v1869_v23, %s1572_s3  ;;  %v300_v33 = vld [vmem:[#allocation2 + $0x10] ss:$2 sm:$0xff] }
 0x1cd   :  { %v243_v24 = vpop.permute.xlu1 %242  ;;  %v1905_v42 = vld [vmem:[#allocation2 + $0x6b] ss:$2 sm:$0xf]  ;;  %v385_v46 = vld [vmem:[#allocation2 + $0x6c] ss:$2 sm:$0xf] }
 0x1ce   :  { %260 = vst.msk [vmem:[#allocation2 + $0x21] sm:$0xff] %vm255_vm3, %v243_v24  ;;  %343 = vrot.lane.b32.xlu0 %v316_v25, %s1573_s28  ;;  %v477_v55 = vld [vmem:[#allocation2 + $0x6d] ss:$2 sm:$0xf] }
 0x1d1   :  { %v245_v26 = vpop.permute.xlu1 %244  ;;  %v379_v28 = vld [vmem:[#allocation2 + $0x3c] ss:$2 sm:$0xff]  ;;  %v1877_v29 = vld [vmem:[#allocation2 + $0x3b] ss:$2 sm:$0xff] }
 0x1d2   :  { %261 = vst.msk [vmem:[#allocation2 + $0x29] sm:$0xff] %vm255_vm3, %v245_v26  ;;  %406 = vrot.lane.b32.xlu0 %v379_v28, %s1573_s28  ;;  %390 = vrot.lane.b32.xlu1 %v1877_v29, %s1572_s3  ;;  %v471_v50 = vld [vmem:[#allocation2 + $0x3d] ss:$2 sm:$0xff]  ;;  %v363_v4 = vld [vmem:[#allocation2 + $0x3a] ss:$2 sm:$0xff] }
 0x1d5   :  { %v247_v30 = vpop.permute.xlu1 %246  ;;  %v429_v48 = vld [vmem:[#allocation2 + $0x13] ss:$2 sm:$0xff] }
 0x1d6   :  { %262 = vst.msk [vmem:[#allocation2 + $0x31] sm:$0xff] %vm255_vm3, %v247_v30 }
 0x1d9   :  { %v277_v31 = vpop.permute.xlu1 %276  ;;  %v1884_v32 = vld [vmem:[#allocation2 + $0x21] ss:$2 sm:$0xff]  ;;  %v318_v35 = vld [vmem:[#allocation2 + $0x22] ss:$2 sm:$0xff] }
 0x1da   :  { %294 = vst.msk [vmem:[#allocation2 + $0x53] sm:$0xff] %vm255_vm3, %v277_v31  ;;  %329 = vrot.lane.b32.xlu1 %v1884_v32, %s1572_s3  ;;  %v302_v5 = vld [vmem:[#allocation2 + $0x20] ss:$2 sm:$0xff] }
 0x1dd   :  { %v281_v34 = vpop.permute.xlu1 %280  ;;  %v1889_v36 = vld [vmem:[#allocation2 + $0x31] ss:$2 sm:$0xf]  ;;  %v320_v37 = vld [vmem:[#allocation2 + $0x32] ss:$2 sm:$0xf] }
 0x1de   :  { %296 = vst.msk [vmem:[#allocation2 + $0x63] sm:$0xff] %vm255_vm3, %v281_v34  ;;  %345 = vrot.lane.b32.xlu1 %v318_v35, %s1573_s28  ;;  %331 = vrot.lane.b32.xlu0 %v1889_v36, %s1572_s3  ;;  %v431_v49 = vld [vmem:[#allocation2 + $0x23] ss:$2 sm:$0xff]  ;;  %v433_v53 = vld [vmem:[#allocation2 + $0x33] ss:$2 sm:$0xf] }
 0x1df   :  { %v304_v9 = vld [vmem:[#allocation2 + $0x30] ss:$2 sm:$0xf]  ;;  %vm1007_vm3 = vcmask 122880  }
 0x1e1   :  { %v1895_v38 = vld [vmem:[#allocation2 + $0x4b] ss:$2 sm:$0xff]  ;;  %v381_v40 = vld [vmem:[#allocation2 + $0x4c] ss:$2 sm:$0xff] }
 0x1e2   :  { %347 = vrot.lane.b32.xlu0 %v320_v37, %s1573_s28  ;;  %392 = vrot.lane.b32.xlu1 %v1895_v38, %s1572_s3  ;;  %v473_v52 = vld [vmem:[#allocation2 + $0x4d] ss:$2 sm:$0xff]  ;;  %v365_v14 = vld [vmem:[#allocation2 + $0x4a] ss:$2 sm:$0xff] }
 0x1e5   :  { %v1900_v41 = vld [vmem:[#allocation2 + $0x5b] ss:$2 sm:$0xff]  ;;  %v383_v44 = vld [vmem:[#allocation2 + $0x5c] ss:$2 sm:$0xff] }
 0x1e6   :  { %408 = vrot.lane.b32.xlu1 %v381_v40, %s1573_s28  ;;  %394 = vrot.lane.b32.xlu0 %v1900_v41, %s1572_s3  ;;  %v475_v54 = vld [vmem:[#allocation2 + $0x5d] ss:$2 sm:$0xff]  ;;  %v369_v34 = vld [vmem:[#allocation2 + $0x6a] ss:$2 sm:$0xf] }
 0x1ea   :  { %396 = vrot.lane.b32.xlu1 %v1905_v42, %s1572_s3  ;;  %410 = vrot.lane.b32.xlu0 %v383_v44, %s1573_s28 }
 0x1ee   :  { %434 = vrot.lane.b32.xlu1 %v314_v22, %s1572_s3  ;;  %412 = vrot.lane.b32.xlu0 %v385_v46, %s1573_s28  ;;  %v367_v22 = vld [vmem:[#allocation2 + $0x5a] ss:$2 sm:$0xff] }
 0x1f2   :  { %436 = vrot.lane.b32.xlu1 %v316_v25, %s1572_s3  ;;  %450 = vrot.lane.b32.xlu0 %v427_v47, %s1573_s28 }
 0x1f6   :  { %452 = vrot.lane.b32.xlu1 %v429_v48, %s1573_s28  ;;  %438 = vrot.lane.b32.xlu0 %v318_v35, %s1572_s3 }
 0x1fa   :  { %454 = vrot.lane.b32.xlu1 %v431_v49, %s1573_s28  ;;  %478 = vrot.lane.b32.xlu0 %v379_v28, %s1572_s3 }
 0x1fe   :  { %494 = vrot.lane.b32.xlu1 %v471_v50, %s1573_s28  ;;  %480 = vrot.lane.b32.xlu0 %v381_v40, %s1572_s3 }
 0x202   :  { %496 = vrot.lane.b32.xlu1 %v473_v52, %s1573_s28  ;;  %440 = vrot.lane.b32.xlu0 %v320_v37, %s1572_s3 }
 0x206   :  { %482 = vrot.lane.b32.xlu1 %v383_v44, %s1572_s3  ;;  %456 = vrot.lane.b32.xlu0 %v433_v53, %s1573_s28 }
 0x20a   :  { %498 = vrot.lane.b32.xlu1 %v475_v54, %s1573_s28  ;;  %484 = vrot.lane.b32.xlu0 %v385_v46, %s1572_s3 }
 0x20e   :  { %500 = vrot.lane.b32.xlu0 %v477_v55, %s1573_s28 }
 0x238   :  { %v326_v56 = vpop.permute.xlu1 %325 }
 0x239   :  { %v353_v0 = vsel %vm200_vm1, %v298_v58, %v326_v56 }
 0x23c   :  { %v328_v2 = vpop.permute.xlu0 %327  ;;  %v342_v59 = vpop.permute.xlu1 %341 }
 0x23d   :  { %v358_v60 = vsel %vm357_vm5, %v353_v0, %v342_v59  ;;  %v354_v1 = vsel %vm200_vm1, %v300_v33, %v328_v2 }
 0x23e   :  { %1394 = vmatprep.mubr.msk.f32.mxu0 %vm544_vm6, %v358_v60 }
 0x240   :  { %v344_v61 = vpop.permute.xlu0 %343 }
 0x241   :  { %v359_v62 = vsel %vm357_vm5, %v354_v1, %v344_v61 }
 0x242   :  { %1395 = vmatmul.mubr.msk.f32.vlgmr.msra.gmra.mxu0 %vm544_vm6, %v359_v62 }
 0x244   :  { %v391_v45 = vpop.permute.xlu1 %390  ;;  %v407_v63 = vpop.permute.xlu0 %406 }
 0x245   :  { %v418_v57 = vsel %vm200_vm1, %v363_v4, %v391_v45 }
 0x246   :  { %v422_v8 = vsel %vm357_vm5, %v418_v57, %v407_v63 }
 0x247   :  { %v519_v10 = vrot.slane %v422_v8, 4 }
 0x24c   :  { %v330_v3 = vpop.permute.xlu1 %329 }
 0x24d   :  { %v355_v20 = vsel %vm200_vm1, %v302_v5, %v330_v3 }
 0x250   :  { %v332_v6 = vpop.permute.xlu0 %331  ;;  %v346_v27 = vpop.permute.xlu1 %345 }
 0x251   :  { %v360_v7 = vsel %vm357_vm5, %v355_v20, %v346_v27  ;;  %v356_v11 = vsel %vm200_vm1, %v304_v9, %v332_v6 }
 0x252   :  { %1397 = vmatprep.mubr.msk.f32.mxu0 %vm544_vm6, %v360_v7 }
 0x254   :  { %v348_v12 = vpop.permute.xlu0 %347  ;;  %v393_v39 = vpop.permute.xlu1 %392 }
 0x255   :  { %v361_v51 = vsel %vm357_vm5, %v356_v11, %v348_v12  ;;  %v419_v15 = vsel %vm200_vm1, %v365_v14, %v393_v39 }
 0x256   :  { %v539_v13 = vsel %vm518_vm7, %v361_v51, %v519_v10 }
 0x257   :  { %1398 = vmatmul.mubr.msk.f32.gmra.mxu0 %vm544_vm6, %v539_v13 }
 0x258   :  { %v395_v16 = vpop.permute.xlu0 %394  ;;  %v409_v17 = vpop.permute.xlu1 %408 }
 0x259   :  { %v423_v18 = vsel %vm357_vm5, %v419_v15, %v409_v17  ;;  %v420_v24 = vsel %vm200_vm1, %v367_v22, %v395_v16 }
 0x25a   :  { %v520_v21 = vrot.slane %v423_v18, 4  ;;  %v1316_v18 = vld [vmem:[%s2205_s4] ss:$0 sm:$0xff]  ;;  %s1583_s4 = smov 96  }
 0x25c   :  { %v411_v25 = vpop.permute.xlu0 %410  ;;  %v397_v26 = vpop.permute.xlu1 %396  ;;  %v521_v28 = vsel %vm518_vm7, %v519_v10, %v520_v21 }
 0x25d   :  { %v424_v30 = vsel %vm357_vm5, %v420_v24, %v411_v25  ;;  %1400 = vmatprep.mubr.msk.f32.mxu0 %vm544_vm6, %v521_v28  ;;  %v421_v35 = vsel %vm200_vm1, %v369_v34, %v397_v26 }
 0x25e   :  { %v522_v31 = vrot.slane %v424_v30, 4 }
 0x260   :  { %v413_v37 = vpop.permute.xlu0 %412  ;;  %v435_v40 = vpop.permute.xlu1 %434  ;;  %v523_v44 = vsel %vm518_vm7, %v520_v21, %v522_v31 }
 0x261   :  { %v425_v46 = vsel %vm357_vm5, %v421_v35, %v413_v37  ;;  %1401 = vmatmul.mubr.msk.f32.gmra.mxu0 %vm544_vm6, %v523_v44  ;;  %v462_v48 = vsel %vm200_vm1, %v1863_v19, %v435_v40 }
 0x262   :  { %v524_v47 = vrot.slane %v425_v46, 4 }
 0x264   :  { %v451_v49 = vpop.permute.xlu0 %450  ;;  %v437_v50 = vpop.permute.xlu1 %436  ;;  %v525_v52 = vsel %vm518_vm7, %v522_v31, %v524_v47 }
 0x265   :  { %v466_v53 = vsel %vm357_vm5, %v462_v48, %v451_v49  ;;  %1403 = vmatprep.mubr.msk.f32.mxu0 %vm544_vm6, %v525_v52  ;;  %v463_v54 = vsel %vm200_vm1, %v1869_v23, %v437_v50 }
 0x266   :  { %1404 = vmatmul.mubr.msk.f32.gmra.mxu0 %vm544_vm6, %v466_v53 }
 0x268   :  { %v439_v55 = vpop.permute.xlu0 %438  ;;  %v453_v56 = vpop.permute.xlu1 %452 }
 0x269   :  { %v467_v58 = vsel %vm357_vm5, %v463_v54, %v453_v56  ;;  %v464_v19 = vsel %vm200_vm1, %v1884_v32, %v439_v55 }
 0x26a   :  { %1406 = vmatprep.mubr.msk.f32.mxu0 %vm544_vm6, %v467_v58 }
 0x26c   :  { %v479_v0 = vpop.permute.xlu0 %478  ;;  %v455_v2 = vpop.permute.xlu1 %454 }
 0x26d   :  { %v468_v59 = vsel %vm357_vm5, %v464_v19, %v455_v2  ;;  %v506_v23 = vsel %vm200_vm1, %v1877_v29, %v479_v0 }
 0x26e   :  { %1407 = vmatmul.mubr.msk.f32.gmra.mxu0 %vm544_vm6, %v468_v59 }
 0x270   :  { %v481_v60 = vpop.permute.xlu0 %480  ;;  %v495_v33 = vpop.permute.xlu1 %494 }
 0x271   :  { %v507_v1 = vsel %vm200_vm1, %v1895_v38, %v481_v60  ;;  %v510_v45 = vsel %vm357_vm5, %v506_v23, %v495_v33  ;;  %v876_v60 = vld [vmem:[%s2206_s5 + $0x70] sm:$0xff]  ;;  %v875_v33 = vld [vmem:[%s2206_s5 + $0x68] sm:$0xff]  ;;  %v874_v23 = vld [vmem:[%s2206_s5 + $0x60] sm:$0xff] }
 0x272   :  { %v531_v3 = vrot.slane %v510_v45, 4  ;;  %1415 = vmatprep.subr.mxu1 %v876_v60  ;;  %v870_v45 = vld [vmem:[%s2206_s5 + $0x40] sm:$0xff] }
 0x273   :  { %1416 = vmatpush3.msra.mxu1 %v876_v60 }
 0x274   :  { %v441_v61 = vpop.permute.xlu0 %440  ;;  %v497_v62 = vpop.permute.xlu1 %496  ;;  %1417 = vmatprep.subr.mxu1 %v875_v33 }
 0x275   :  { %v511_v32 = vsel %vm357_vm5, %v507_v1, %v497_v62  ;;  %v465_v4 = vsel %vm200_vm1, %v1889_v36, %v441_v61  ;;  %1418 = vmatpush3.msra.mxu1 %v875_v33  ;;  %v873_v1 = vld [vmem:[%s2206_s5 + $0x58] sm:$0xff]  ;;  %v872_v61 = vld [vmem:[%s2206_s5 + $0x50] sm:$0xff]  ;;  %v871_v62 = vld [vmem:[%s2206_s5 + $0x48] sm:$0xff] }
 0x276   :  { %v532_v63 = vrot.slane %v511_v32, 4  ;;  %1419 = vmatprep.subr.mxu1 %v874_v23  ;;  %v869_v32 = vld [vmem:[%s2206_s5 + $0x38] sm:$0xff] }
 0x277   :  { %1420 = vmatpush3.msra.mxu1 %v874_v23  ;;  %v1102_v23 = vld [vmem:[%s2208_s7 + $0x78] sm:$0xff] }
 0x278   :  { %v457_v57 = vpop.permute.xlu0 %456  ;;  %v483_v5 = vpop.permute.xlu1 %482  ;;  %v533_v38 = vsel %vm518_vm7, %v531_v3, %v532_v63  ;;  %1421 = vmatprep.subr.mxu1 %v873_v1  ;;  %1452 = vmatpush3.msra.mxu0 %v1102_v23 }
 0x279   :  { %v469_v20 = vsel %vm357_vm5, %v465_v4, %v457_v57  ;;  %v508_v6 = vsel %vm200_vm1, %v1900_v41, %v483_v5  ;;  %1422 = vmatpush3.msra.mxu1 %v873_v1  ;;  %v1101_v1 = vld [vmem:[%s2208_s7 + $0x70] sm:$0xff]  ;;  %1453 = vmatprep.subr.mxu0 %v1570_v43 }
 0x27a   :  { %v540_v29 = vsel %vm518_vm7, %v469_v20, %v531_v3  ;;  %1423 = vmatprep.subr.mxu1 %v872_v61  ;;  %v868_v20 = vld [vmem:[%s2206_s5 + $0x30] sm:$0xff]  ;;  %1454 = vmatpush3.msra.mxu0 %v1101_v1 }
 0x27b   :  { %1409 = vmatprep.mubr.msk.f32.mxu0 %vm544_vm6, %v540_v29  ;;  %1424 = vmatpush3.msra.mxu1 %v872_v61  ;;  %v867_v29 = vld [vmem:[%s2206_s5 + $0x28] sm:$0xff] }
 0x27c   :  { %v485_v27 = vpop.permute.xlu0 %484  ;;  %1410 = vmatmul.mubr.msk.f32.gmra.mxu0 %vm544_vm6, %v533_v38  ;;  %v499_v8 = vpop.permute.xlu1 %498  ;;  %1425 = vmatprep.subr.mxu1 %v871_v62  ;;  %v1100_v61 = vld [vmem:[%s2208_s7 + $0x68] sm:$0xff] }
 0x27d   :  { %v512_v7 = vsel %vm357_vm5, %v508_v6, %v499_v8  ;;  %v509_v9 = vsel %vm200_vm1, %v1905_v42, %v485_v27  ;;  %1426 = vmatpush3.msra.mxu1 %v871_v62  ;;  %v866_v27 = vld [vmem:[%s2206_s5 + $0x20] sm:$0xff]  ;;  %v865_v8 = vld [vmem:[%s2206_s5 + $0x18] sm:$0xff]  ;;  %vm860_vm1 = vcmask 1044480   ;;  %1455 = vmatprep.subr.mxu0 %v1570_v43 }
 0x27e   :  { %v534_v36 = vrot.slane %v512_v7, 4  ;;  %1427 = vmatprep.subr.mxu1 %v870_v45  ;;  %v864_v7 = vld [vmem:[%s2206_s5 + $0x10] sm:$0xff]  ;;  %v1099_v62 = vld [vmem:[%s2208_s7 + $0x60] sm:$0xff]  ;;  %1456 = vmatpush3.msra.mxu0 %v1100_v61 }
 0x27f   :  { %1428 = vmatpush3.msra.mxu1 %v870_v45  ;;  %v1321_v45 = vld [vmem:[%s2207_s6] ss:$0 sm:$0xff]  ;;  %1457 = vmatprep.subr.mxu0 %v1570_v43 }
 0x280   :  { %v501_v10 = vpop.permute.xlu0 %500  ;;  %v535_v11 = vsel %vm518_vm7, %v532_v63, %v534_v36  ;;  %1429 = vmatprep.subr.mxu1 %v869_v32  ;;  %1458 = vmatpush3.msra.mxu0 %v1099_v62 }
 0x281   :  { %v513_v12 = vsel %vm357_vm5, %v509_v9, %v501_v10  ;;  %1412 = vmatprep.mubr.msk.f32.mxu0 %vm544_vm6, %v535_v11  ;;  %1430 = vmatpush3.msra.mxu1 %v869_v32  ;;  %v862_v11 = vld [vmem:[%s2206_s5] sm:$0xff]  ;;  %vm1053_vm5 = vcmask 254080  }
 0x282   :  { %v536_v39 = vrot.slane %v513_v12, 4  ;;  %1431 = vmatprep.subr.mxu1 %v868_v20  ;;  %1459 = vmatprep.subr.mxu0 %v1570_v43 }
 0x283   :  { %1432 = vmatpush3.msra.mxu1 %v868_v20 }
 0x284   :  { %v537_v41 = vsel %vm518_vm7, %v534_v36, %v536_v39  ;;  %1433 = vmatprep.subr.mxu1 %v867_v29  ;;  %v863_v36 = vld [vmem:[%s2206_s5 + $0x8] sm:$0xff]  ;;  %s1577_s5 = smov 112  }
 0x285   :  { %1413 = vmatmul.mubr.msk.f32.gmra.mxu0 %vm544_vm6, %v537_v41  ;;  %1434 = vmatpush3.msra.mxu1 %v867_v29  ;;  %vm1013_vm6 = vcmask 255105  }
 0x286   :  { %1435 = vmatprep.subr.mxu1 %v866_v27 }
 0x287   :  { %1436 = vmatpush3.msra.mxu1 %v866_v27  ;;  %v1096_v27 = vld [vmem:[%s2208_s7 + $0x48] sm:$0xff] }
 0x288   :  { %1437 = vmatprep.subr.mxu1 %v865_v8 }
 0x289   :  { %1438 = vmatpush3.msra.mxu1 %v865_v8  ;;  %v1095_v8 = vld [vmem:[%s2208_s7 + $0x40] sm:$0xff] }
 0x28a   :  { %1439 = vmatprep.subr.mxu1 %v864_v7 }
 0x28b   :  { %1440 = vmatpush3.msra.mxu1 %v864_v7  ;;  %v1094_v7 = vld [vmem:[%s2208_s7 + $0x38] sm:$0xff] }
 0x28c   :  { %1441 = vmatprep.subr.mxu1 %v863_v36 }
 0x28d   :  { %1442 = vmatpush3.msra.mxu1 %v863_v36  ;;  %v1093_v36 = vld [vmem:[%s2208_s7 + $0x30] sm:$0xff] }
 0x28e   :  { %1443 = vmatprep.subr.mxu1 %v862_v11 }
 0x28f   :  { %1444 = vmatpush3.msra.mxu1 %v862_v11  ;;  %v1090_v11 = vld [vmem:[%s2208_s7 + $0x18] sm:$0xff] }
 0x290   :  { %1486 = vmatprep.subr.mxu1 %v1570_v43 }
 0x302   :  { %v1396_v42 = vpop.f32.mrf.mxu0 }
 0x304   :  { %v651_v51 = vpop.f32.mrf.mxu0 }
 0x317   :  { %v1399_v13 = vpop.f32.mrf.mxu0 }
 0x319   :  { %v661_v14 = vpop.f32.mrf.mxu0 }
 0x321   :  { %v1402_v15 = vpop.f32.mrf.mxu0 }
 0x323   :  { %v671_v16 = vpop.f32.mrf.mxu0 }
 0x326   :  { %v1405_v17 = vpop.f32.mrf.mxu0 }
 0x327   :  { %v720_v21 = vmax.f32 %v651_v51, %v1405_v17 }
 0x328   :  { %v681_v25 = vpop.f32.mrf.mxu0 }
 0x329   :  { %v734_v22 = vadd.f32 %v1316_v18, %v720_v21 }
 0x32b   :  { %v741_v24 = vmax.f32 %v734_v22, 0.0 }
 0x32d   :  { %752 = vrot.lane.b32.xlu1 %v741_v24, %s1574_s30 }
 0x32e   :  { %v1408_v26 = vpop.f32.mrf.mxu0 }
 0x32f   :  { %v722_v52 = vmax.f32 %v661_v14, %v1408_v26 }
 0x330   :  { %v691_v28 = vpop.f32.mrf.mxu0 }
 0x331   :  { %v721_v48 = vmax.f32 %v1396_v42, %v691_v28  ;;  %v736_v19 = vadd.f32 %v1316_v18, %v722_v52 }
 0x333   :  { %v735_v55 = vadd.f32 %v1316_v18, %v721_v48  ;;  %v743_v59 = vmax.f32 %v736_v19, 0.0 }
 0x335   :  { %v742_v2 = vmax.f32 %v735_v55, 0.0 }
 0x33c   :  { %v1411_v30 = vpop.f32.mrf.mxu0 }
 0x33d   :  { %v724_v31 = vmax.f32 %v671_v16, %v1411_v30 }
 0x33e   :  { %v701_v34 = vpop.f32.mrf.mxu0 }
 0x33f   :  { %v738_v35 = vadd.f32 %v1316_v18, %v724_v31  ;;  %v723_v37 = vmax.f32 %v1399_v13, %v701_v34 }
 0x341   :  { %v745_v40 = vmax.f32 %v738_v35, 0.0  ;;  %v737_v44 = vadd.f32 %v1316_v18, %v723_v37 }
 0x343   :  { %v744_v46 = vmax.f32 %v737_v44, 0.0  ;;  %773 = vrot.lane.b32.xlu0 %v745_v40, %s1574_s30 }
 0x345   :  { %758 = vrot.lane.b32.xlu1 %v744_v46, %s1574_s30  ;;  %v1414_v47 = vpop.f32.mrf.mxu0 }
 0x346   :  { %v726_v49 = vmax.f32 %v681_v25, %v1414_v47 }
 0x347   :  { %v711_v50 = vpop.f32.mrf.mxu0 }
 0x348   :  { %v740_v53 = vadd.f32 %v1316_v18, %v726_v49  ;;  %v725_v54 = vmax.f32 %v1402_v15, %v711_v50 }
 0x34a   :  { %v747_v56 = vmax.f32 %v740_v53, 0.0  ;;  %v739_v58 = vadd.f32 %v1316_v18, %v725_v54 }
 0x34c   :  { %v746_v0 = vmax.f32 %v739_v58, 0.0  ;;  %777 = vrot.lane.b32.xlu0 %v747_v56, %s1574_s30 }
 0x34e   :  { %775 = vrot.lane.b32.xlu1 %v746_v0, %s1574_s30 }
 0x350   :  { %754 = vrot.lane.b32.xlu0 %v742_v2, %s1574_s30 }
 0x352   :  { %756 = vrot.lane.b32.xlu1 %v743_v59, %s1574_s30 }
 0x39f   :  { %v753_v63 = vpop.permute.xlu1 %752 }
 0x3a0   :  { %765 = vst.msk [vmem:[#allocation3 + $0x1] sm:$0xff] %vm764_vm10, %v753_v63 }
 0x3b5   :  { %v774_v3 = vpop.permute.xlu0 %773 }
 0x3b6   :  { %784 = vst.msk [vmem:[#allocation3 + $0x23] sm:$0xff] %vm764_vm10, %v774_v3 }
 0x3b7   :  { %v759_v4 = vpop.permute.xlu1 %758 }
 0x3b8   :  { %769 = vst.msk [vmem:[#allocation3 + $0x19] sm:$0xf] %vm768_vm11, %v759_v4  ;;  %vm1068_vm11 = vcmask 650755  }
 0x3b9   :  { %783 = vst.msk [vmem:[#allocation3 + $0x1b] sm:$0xf0] %vm782_vm12, %v759_v4  ;;  %vm1028_vm12 = vcmask 651780  }
 0x3be   :  { %v778_v57 = vpop.permute.xlu0 %777 }
 0x3bf   :  { %786 = vst.msk [vmem:[#allocation3 + $0x33] sm:$0xff] %vm764_vm10, %v778_v57  ;;  %v1098_v57 = vld [vmem:[%s2208_s7 + $0x58] sm:$0xff] }
 0x3c0   :  { %v776_v5 = vpop.permute.xlu1 %775  ;;  %1460 = vmatpush3.msra.mxu0 %v1098_v57 }
 0x3c1   :  { %785 = vst.msk [vmem:[#allocation3 + $0x2b] sm:$0xff] %vm764_vm10, %v776_v5  ;;  %v1097_v5 = vld [vmem:[%s2208_s7 + $0x50] sm:$0xff]  ;;  %1461 = vmatprep.subr.mxu0 %v1570_v43 }
 0x3c2   :  { %v755_v38 = vpop.permute.xlu0 %754  ;;  %1462 = vmatpush3.msra.mxu0 %v1097_v5 }
 0x3c3   :  { %766 = vst.msk [vmem:[#allocation3 + $0x9] sm:$0xff] %vm764_vm10, %v755_v38  ;;  %1463 = vmatprep.subr.mxu0 %v1570_v43 }
 0x3c4   :  { %v757_v6 = vpop.permute.xlu1 %756  ;;  %1464 = vmatpush3.msra.mxu0 %v1096_v27 }
 0x3c5   :  { %767 = vst.msk [vmem:[#allocation3 + $0x11] sm:$0xff] %vm764_vm10, %v757_v6  ;;  %1465 = vmatprep.subr.mxu0 %v1570_v43  ;;  %vm1023_vm10 = vcmask 519555  }
 0x3c6   :  { %1466 = vmatpush3.msra.mxu0 %v1095_v8 }
 0x3c7   :  { %1467 = vmatprep.subr.mxu0 %v1570_v43 }
 0x3c8   :  { %v806_v41 = vld [vmem:[#allocation3 + $0x1f] ss:$4 sm:$0x7f]  ;;  %v808_v42 = vld [vmem:[#allocation3 + $0x20] ss:$4 sm:$0x7f]  ;;  %1468 = vmatpush3.msra.mxu0 %v1094_v7 }
 0x3c9   :  { %v834_v51 = vld [vmem:[#allocation3 + $0x21] ss:$4 sm:$0x7f]  ;;  %v836_v13 = vld [vmem:[#allocation3 + $0x22] ss:$4 sm:$0x7f]  ;;  %1469 = vmatprep.subr.mxu0 %v1570_v43 }
 0x3ca   :  { %v804_v22 = vld [vmem:[#allocation3 + $0x1e] ss:$4 sm:$0x7f]  ;;  %1470 = vmatpush3.msra.mxu0 %v1093_v36 }
 0x3cb   :  { %1471 = vmatprep.subr.mxu0 %v1570_v43 }
 0x3cc   :  { %v820_v9 = vld [vmem:[#allocation3 + $0x3] ss:$4 sm:$0x7f]  ;;  %v789_v10 = vld [vmem:[#allocation3 + $0x1] ss:$4 sm:$0x7f] }
 0x3cd   :  { %824 = vrot.lane.b32.xlu0 %v820_v9, %s1575_s16  ;;  %793 = vrot.lane.b32.xlu1 %v789_v10, %s1575_s16  ;;  %v822_v12 = vld [vmem:[#allocation3 + $0x4] ss:$4 sm:$0x7f]  ;;  %v791_v39 = vld [vmem:[#allocation3 + $0x2] ss:$4 sm:$0x7f] }
 0x3ce   :  { %v787_v28 = vld [vmem:[#allocation3] ss:$4 sm:$0x7f] }
 0x3cf   :  { %v1092_v9 = vld [vmem:[%s2208_s7 + $0x28] sm:$0xff]  ;;  %v1091_v10 = vld [vmem:[%s2208_s7 + $0x20] sm:$0xff] }
 0x3d0   :  { %1472 = vmatpush3.msra.mxu0 %v1092_v9 }
 0x3d1   :  { %828 = vrot.lane.b32.xlu0 %v822_v12, %s1576_s19  ;;  %797 = vrot.lane.b32.xlu1 %v791_v39, %s1576_s19  ;;  %v1089_v12 = vld [vmem:[%s2208_s7 + $0x10] sm:$0xff] }
 0x3d2   :  { %1473 = vmatprep.subr.mxu0 %v1570_v43 }
 0x3d3   :  { %1474 = vmatpush3.msra.mxu0 %v1091_v10 }
 0x3d4   :  { %1475 = vmatprep.subr.mxu0 %v1570_v43 }
 0x3d5   :  { %810 = vrot.lane.b32.xlu0 %v806_v41, %s1575_s16  ;;  %814 = vrot.lane.b32.xlu1 %v808_v42, %s1576_s19  ;;  %v1188_v41 = vld [vmem:[%s2210_s9 + $0x38] sm:$0xf] }
 0x3d6   :  { %1476 = vmatpush3.msra.mxu0 %v1090_v11 }
 0x3d7   :  { %1477 = vmatprep.subr.mxu0 %v1570_v43 }
 0x3d8   :  { %1478 = vmatpush3.msra.mxu0 %v1089_v12 }
 0x3d9   :  { %838 = vrot.lane.b32.xlu0 %v834_v51, %s1575_s16  ;;  %842 = vrot.lane.b32.xlu1 %v836_v13, %s1576_s19  ;;  %v1080_v51 = vld [vmem:[%s2202_s1 + $0x1] sm:$0x1]  ;;  %v1040_v13 = vld [vmem:[%s2202_s1] sm:$0x1] }
 0x3da   :  { %1479 = vmatprep.subr.mxu0 %v1570_v43 }
 0x43f   :  { %v825_v14 = vpop.permute.xlu0 %824  ;;  %v794_v15 = vpop.permute.xlu1 %793 }
 0x440   :  { %v831_v18 = vsel %vm217_vm8, %v791_v39, %v825_v14  ;;  %v800_v31 = vsel %vm217_vm8, %v787_v28, %v794_v15  ;;  %v1088_v39 = vld [vmem:[%s2208_s7 + $0x8] sm:$0xff]  ;;  %v1087_v14 = vld [vmem:[%s2208_s7] sm:$0xff] }
 0x441   :  { %1480 = vmatpush3.msra.mxu0 %v1088_v39  ;;  %v1186_v15 = vld [vmem:[%s2210_s9 + $0x28] sm:$0xff] }
 0x442   :  { %1481 = vmatprep.subr.mxu0 %v1570_v43 }
 0x443   :  { %v829_v16 = vpop.permute.xlu0 %828  ;;  %v798_v17 = vpop.permute.xlu1 %797  ;;  %1482 = vmatpush3.msra.mxu0 %v1087_v14 }
 0x444   :  { %v832_v21 = vsel %vm801_vm13, %v831_v18, %v829_v16  ;;  %v802_v37 = vsel %vm801_vm13, %v800_v31, %v798_v17  ;;  %v1185_v16 = vld [vmem:[%s2210_s9 + $0x20] sm:$0xff]  ;;  %v1184_v17 = vld [vmem:[%s2210_s9 + $0x18] sm:$0xff] }
 0x445   :  { %v851_v34 = vrot.slane %v832_v21, 2 }
 0x447   :  { %v811_v24 = vpop.permute.xlu0 %810  ;;  %v815_v25 = vpop.permute.xlu1 %814 }
 0x448   :  { %v817_v26 = vsel %vm217_vm8, %v804_v22, %v811_v24 }
 0x449   :  { %v818_v30 = vsel %vm801_vm13, %v817_v26, %v815_v25 }
 0x44a   :  { %v848_v35 = vrot.slane %v818_v30, 1 }
 0x44b   :  { %v839_v40 = vpop.permute.xlu0 %838  ;;  %v843_v44 = vpop.permute.xlu1 %842 }
 0x44c   :  { %v845_v46 = vsel %vm217_vm8, %v808_v42, %v839_v40  ;;  %v857_v47 = vsel %vm856_vm14, %v802_v37, %v848_v35  ;;  %v859_v48 = vsel %vm858_vm15, %v848_v35, %v851_v34  ;;  %v1187_v42 = vld [vmem:[%s2210_s9 + $0x30] sm:$0xff]  ;;  %vm1018_vm8 = vcmask 387330  }
 0x44d   :  { %v846_v49 = vsel %vm801_vm13, %v845_v46, %v843_v44  ;;  %1445 = vmatprep.mubr.msk.f32.mxu1 %vm877_vm0, %v857_v47  ;;  %vm1073_vm13 = vcmask 782980   ;;  %vm1033_vm14 = vcmask 784005   ;;  %vm1078_vm15 = vcmask 915205   ;;  %v1183_v47 = vld [vmem:[%s2210_s9 + $0x10] sm:$0xff] }
 0x44e   :  { %v854_v50 = vrot.slane %v846_v49, 3  ;;  %1446 = vmatmul.mubr.msk.f32.vlgmr.msra.gmra.mxu1 %vm877_vm0, %v859_v48  ;;  %v1182_v48 = vld [vmem:[%s2210_s9 + $0x8] sm:$0xff]  ;;  %v1181_v49 = vld [vmem:[%s2210_s9] sm:$0xff] }
 0x44f   :  { %1487 = vmatpush3.msk.msra.mxu1 %vm518_vm7, %v1188_v41  ;;  %vm1058_vm7 = vcmask 386305  }
 0x450   :  { %v861_v52 = vsel %vm860_vm1, %v851_v34, %v854_v50  ;;  %1488 = vmatprep.subr.mxu1 %v1570_v43  ;;  %vm1045_vm1 = vcmask 1041280  }
 0x451   :  { %1448 = vmatprep.mubr.msk.f32.mxu1 %vm877_vm0, %v861_v52  ;;  %1489 = vmatpush3.msra.mxu1 %v1187_v42 }
 0x452   :  { %1449 = vmatmul.mubr.msk.f32.gmra.mxu1 %vm877_vm0, %v854_v50  ;;  %1490 = vmatprep.subr.mxu1 %v1570_v43  ;;  %vm1038_vm0 = vcmask 916230   ;;  %v1322_v50 = vld [vmem:[%s2209_s8] ss:$0 sm:$0xff]  ;;  %s1584_s8 = smov [#allocation8]  }
 0x453   :  { %1491 = vmatpush3.msra.mxu1 %v1186_v15  ;;  %s1291_s9 = sshll.u32 %s1584_s8, 4  ;;  %s1292_s9 = int_to_ptr.vmem [resolvable:$true] %s1291_s9 }
 0x454   :  { %1492 = vmatprep.subr.mxu1 %v1570_v43  ;;  %p1550_p6 = scmp.lt.s32.totalorder %s1292_s9, %s1292_s9 }
 0x455   :  { %1493 = vmatpush3.msra.mxu1 %v1185_v16 }
 0x456   :  { %1494 = vmatprep.subr.mxu1 %v1570_v43 }
 0x457   :  { %1495 = vmatpush3.msra.mxu1 %v1184_v17 }
 0x458   :  { %1496 = vmatprep.subr.mxu1 %v1570_v43 }
 0x459   :  { %1497 = vmatpush3.msra.mxu1 %v1183_v47 }
 0x45a   :  { %1498 = vmatprep.subr.mxu1 %v1570_v43 }
 0x45b   :  { %1499 = vmatpush3.msra.mxu1 %v1182_v48 }
 0x45c   :  { %1500 = vmatprep.subr.mxu1 %v1570_v43 }
 0x45d   :  { %1501 = vmatpush3.msra.mxu1 %v1181_v49 }
 0x50e   :  { %v1447_v53 = vpop.f32.mrf.mxu1 }
 0x50f   :  { %v977_v58 = vrot.slane %v1447_v53, 6 }
 0x510   :  { %v955_v54 = vpop.f32.mrf.mxu1 }
 0x512   :  { %v1450_v55 = vpop.f32.mrf.mxu1 }
 0x513   :  { %v980_v19 = vrot.slane %v1450_v55, 6 }
 0x514   :  { %v965_v56 = vpop.f32.mrf.mxu1 }
 0x515   :  { %v978_v0 = vrot.slane %v965_v56, 6  ;;  %v1323_v56 = vld [vmem:[%s2211_s10] ss:$0 sm:$0xff]  ;;  %s1545_s10 = scalar_lea.vmem %s1292_s9, 32 }
 0x516   :  { %p1546_p5 = scmp.ne.s32.totalorder %s1292_s9, %s1545_s10  ;;  %p1551_p7 = scmp.lt.s32.totalorder %s1545_s10, %s1545_s10 }
 0x517   :  { %v981_v2 = vsel %vm581_vm4, %v978_v0, %v980_v19  ;;  %v979_v59 = vsel %vm581_vm4, %v977_v58, %v978_v0  ;;  %vm1582_vm4 = vmmov 0  }
 0x518   :  { %v985_v60 = vmax.f32 %v1447_v53, %v981_v2  ;;  %v984_v33 = vmax.f32 %v955_v54, %v979_v59  ;;  %1483 = vmatprep.mubr.msk.f32.mxu0 %vm1582_vm4, %v1570_v43  ;;  %1502 = vmatprep.mubr.msk.f32.mxu1 %vm1582_vm4, %v1570_v43  ;;  %p1552_p8 = por %p1551_p7, %p1550_p6 }
 0x51a   :  { %990 = vrot.lane.b32.xlu1 %v985_v60, %s1577_s5  ;;  %988 = vrot.lane.b32.xlu0 %v984_v33, %s1577_s5  ;;  %p1553_p9 = pnand %p1552_p8, %p1546_p5 }
 0x58c   :  { %v991_v32 = vpop.permute.xlu1 %990  ;;  %v989_v63 = vpop.permute.xlu0 %988 }
 0x58d   :  { %v995_v3 = vmax.f32 %v985_v60, %v991_v32  ;;  %v994_v4 = vmax.f32 %v984_v33, %v989_v63 }
 0x58f   :  { %v1004_v20 = vadd.f32 %v1321_v45, %v995_v3  ;;  %v1003_v29 = vadd.f32 %v1321_v45, %v994_v4 }
 0x591   :  { %v1006_v38 = vmax.f32 %v1004_v20, 0.0  ;;  %v1005_v6 = vmax.f32 %v1003_v29, 0.0 }
 0x593   :  { %1050 = vrot.lane.b32.xlu1 %v1006_v38, %s1578_s12  ;;  %1010 = vrot.lane.b32.xlu0 %v1005_v6, %s1578_s12  ;;  %1048 = vst.msk [vmem:[#allocation4 - $0x6] sm:$0x80] %vm1047_vm2, %v1005_v6  ;;  %vm1196_vm2 = vcmask 490496  }
 0x594   :  { %1008 = vst.msk [vmem:[#allocation4] sm:$0x1] %vm1007_vm3, %v1005_v6  ;;  %vm1283_vm3 = vcmask 402432  }
 0x597   :  { %1055 = vrot.lane.b32.xlu1 %v1006_v38, %s1579_s17  ;;  %1015 = vrot.lane.b32.xlu0 %v1005_v6, %s1579_s17 }
 0x59b   :  { %1060 = vrot.lane.b32.xlu1 %v1006_v38, %s1580_s21  ;;  %1020 = vrot.lane.b32.xlu0 %v1005_v6, %s1580_s21 }
 0x59f   :  { %1065 = vrot.lane.b32.xlu1 %v1006_v38, %s1581_s25  ;;  %1025 = vrot.lane.b32.xlu0 %v1005_v6, %s1581_s25 }
 0x5a3   :  { %1070 = vrot.lane.b32.xlu1 %v1006_v38, %s1576_s19  ;;  %1030 = vrot.lane.b32.xlu0 %v1005_v6, %s1576_s19 }
 0x5a7   :  { %1075 = vrot.lane.b32.xlu1 %v1006_v38, %s1583_s4  ;;  %1035 = vrot.lane.b32.xlu0 %v1005_v6, %s1583_s4 }
 0x5ab   :  { %1082 = vrot.lane.b32.xlu1 %v1080_v51, %s1577_s5  ;;  %1042 = vrot.lane.b32.xlu0 %v1040_v13, %s1577_s5 }
 0x605   :  { %v1051_v18 = vpop.permute.xlu1 %1050  ;;  %v1011_v21 = vpop.permute.xlu0 %1010 }
 0x606   :  { %1054 = vst.msk [vmem:[#allocation4 + $0x1] sm:$0x1] %vm1053_vm5, %v1051_v18 }
 0x607   :  { %1014 = vst.msk [vmem:[#allocation4 - $0x1] sm:$0x2] %vm1013_vm6, %v1011_v21 }
 0x609   :  { %v1056_v22 = vpop.permute.xlu1 %1055  ;;  %v1016_v24 = vpop.permute.xlu0 %1015 }
 0x60a   :  { %1059 = vst.msk [vmem:[#allocation4] sm:$0x2] %vm1058_vm7, %v1056_v22 }
 0x60b   :  { %1019 = vst.msk [vmem:[#allocation4 - $0x2] sm:$0x4] %vm1018_vm8, %v1016_v24 }
 0x60d   :  { %v1061_v25 = vpop.permute.xlu1 %1060  ;;  %v1021_v26 = vpop.permute.xlu0 %1020 }
 0x60e   :  { %1064 = vst.msk [vmem:[#allocation4 - $0x1] sm:$0x4] %vm1063_vm9, %v1061_v25 }
 0x60f   :  { %1024 = vst.msk [vmem:[#allocation4 - $0x3] sm:$0x8] %vm1023_vm10, %v1021_v26 }
 0x611   :  { %v1066_v28 = vpop.permute.xlu1 %1065  ;;  %v1026_v30 = vpop.permute.xlu0 %1025 }
 0x612   :  { %1069 = vst.msk [vmem:[#allocation4 - $0x2] sm:$0x8] %vm1068_vm11, %v1066_v28 }
 0x613   :  { %1029 = vst.msk [vmem:[#allocation4 - $0x4] sm:$0x10] %vm1028_vm12, %v1026_v30 }
 0x615   :  { %v1071_v31 = vpop.permute.xlu1 %1070  ;;  %v1031_v34 = vpop.permute.xlu0 %1030 }
 0x616   :  { %1074 = vst.msk [vmem:[#allocation4 - $0x3] sm:$0x10] %vm1073_vm13, %v1071_v31 }
 0x617   :  { %1034 = vst.msk [vmem:[#allocation4 - $0x5] sm:$0x20] %vm1033_vm14, %v1031_v34 }
 0x619   :  { %v1076_v35 = vpop.permute.xlu1 %1075  ;;  %v1036_v37 = vpop.permute.xlu0 %1035 }
 0x61a   :  { %1079 = vst.msk [vmem:[#allocation4 - $0x4] sm:$0x20] %vm1078_vm15, %v1076_v35 }
 0x61b   :  { %1039 = vst.msk [vmem:[#allocation4 - $0x6] sm:$0x40] %vm1038_vm0, %v1036_v37 }
 0x61d   :  { %v1083_v40 = vpop.permute.xlu1 %1082  ;;  %v1043_v44 = vpop.permute.xlu0 %1042 }
 0x61e   :  { %1085 = vst.msk [vmem:[#allocation4 + $0x1] sm:$0x1] %vm1045_vm1, %v1083_v40  ;;  %1046 = vst.msk [vmem:[#allocation4] sm:$0x1] %vm1045_vm1, %v1043_v44 }
 0x625   :  { %v1086_v46 = vld [vmem:[#allocation4] sm:$0x3] }
 0x626   :  { %1484 = vmatmul.mubr.f32.vlgmr.msra.gmra.mxu0 %v1086_v46 }
 0x6e6   :  { %v1176_v52 = vpop.f32.mrf.mxu0 }
 0x6e7   :  { %v1177_v53 = vadd.f32 %v1322_v50, %v1176_v52 }
 0x6e8   :  { %v1485_v54 = vpop.f32.mrf.mxu0 }
 0x6e9   :  { %v1180_v55 = vmax.f32 %v1177_v53, 0.0 }
 0x6eb   :  { %1503 = vmatmul.mubr.msk.f32.vlgmr.msra.gmra.mxu1 %vm1196_vm2, %v1180_v55 }
 0x7ab   :  { %v1269_v58 = vpop.f32.mrf.mxu1 }
 0x7ac   :  { %v1270_v19 = vadd.f32 %v1323_v56, %v1269_v58 }
 0x7ad   :  { %v1504_v0 = vpop.f32.mrf.mxu1 }
 0x7ae   :  { %v1273_v2 = vand.u32 2147483647, %v1270_v19  ;;  %vm1277_vm4 = vcmp.ge.f32.partialorder %v1270_v19, 0.0 }
 0x7b0   :  { %v1274_v43 = vsub.f32 0.0, %v1273_v2 }
 0x7b2   :  { %v1275_v59 = vmul.f32 1.442695, %v1274_v43 }
 0x7b4   :  { %1529 = vpow2.f32 %v1275_v59 }
 0x7c1   :  { %v1530_v60 = vpop.eup %1529 }
 0x7c2   :  { %v1278_v33 = vadd.f32 1.0, %v1530_v60 }
 0x7c4   :  { %1531 = vrcp.f32 %v1278_v33 }
 0x7d1   :  { %v1532_v23 = vpop.eup %1531 }
 0x7d2   :  { %v1281_v1 = vmul.f32 %v1532_v23, %v1530_v60 }
 0x7d4   :  { %v1282_v61 = vsel %vm1277_vm4, %v1532_v23, %v1281_v1 }
 0x7d5   :  { %1284 = vst.msk [vmem:[#allocation8] sm:$0x3] %vm1283_vm3, %v1282_v61 }
 0x7d6   :  { %1556 = shalt.err (!%p1553_p9)
}
 0x7d7   :  { %1294 = dma.vmem_to_hbm [thread:$0]  %s1292_s9, 32, %s2212_s11, [#allocation6]  }
 0x7d8   :  { %1567 = dma.done.wait [#allocation6], 32  }
 0x7d9   :  { %1568 = vsyncadd [#allocation6], 4294967264 }
 0x7da   :  { %1298 = vsyncpa [#allocation6], 1 }
 0x7db   :  { %1299 = vsyncpa [#allocation7], 1 }

</bundles_post_ra>
